<compile_context>
chip_gen: v5e
topology: v5e:2x2
jax: 0.10.0
libtpu: 0.0.40
codegen_flags: <defaults>
</compile_context>

<pallas_src>
import functools

import jax
import jax.numpy as jnp
from jax.experimental import pallas as pl
from jax.experimental.pallas import tpu as pltpu

F32 = jnp.float32

IN_CH = 4          # cfg.in_channels != 3  -> replaced conv_stem
STEM_OUT = 32      # efficientnet conv_stem out_channels
FEAT = 1280        # backbone feature width
N_AUX = 5          # 1280 + 5 classifier input
K, S, PAD = 3, 2, 1  # conv_stem kernel / stride / padding


# ---------------------------------------------------------------------------
# Single fused kernel: tap accumulation (grid reduction) + GAP + projection
# + ReLU + both classifier heads.
# ---------------------------------------------------------------------------
def _fused_kernel(x_ref, wstem_ref, wproj_ref, aux_ref,
                  w1f_ref, w1a_ref, w2f_ref, w2a_ref, scal_ref,
                  out_ref, acc_ref, *, row_tile, oh, ow):
    i = pl.program_id(0)

    @pl.when(i == 0)
    def _():
        acc_ref[...] = jnp.zeros_like(acc_ref)

    x = x_ref[...].astype(jnp.float32)                 # (B, Cin, row_tile, W) f32 math
    w_cols = x.shape[3]

    # Global conv-padded coordinates for this row tile (pad = 1 on each side;
    # the pad rows/cols are zeros, so masks only need range + parity checks).
    g_row = (jax.lax.broadcasted_iota(jnp.int32, (row_tile, 1), 0)
             + i * row_tile + PAD)                     # (row_tile, 1)
    g_col = (jax.lax.broadcasted_iota(jnp.int32, (1, w_cols), 1)
             + PAD)                                    # (1, W)

    # Stage 1: per-kh masked row sums (rows hit by tap row-offset kh).
    row_sums = []
    for kh in range(K):
        rmask = ((g_row >= kh) & (g_row < kh + S * oh)
                 & ((g_row % S) == (kh % S))).astype(jnp.float32)      # (row_tile, 1)
        row_sums.append(jnp.sum(x * rmask, axis=2))                    # (B, Cin, W)

    # Stage 2: per-(kh, kw) masked column sums -> per-tap partial sums.
    parts = []
    for kh in range(K):
        for kw in range(K):
            cmask = ((g_col >= kw) & (g_col < kw + S * ow)
                     & ((g_col % S) == (kw % S))).astype(jnp.float32)  # (1, W)
            parts.append(jnp.sum(row_sums[kh] * cmask, axis=2))        # (B, Cin)
    acc_ref[...] += jnp.concatenate(parts, axis=1)     # (B, K*K*Cin) in (kh, kw, cin) order

    @pl.when(i == pl.num_programs(0) - 1)
    def _():
        inv_hw = 1.0 / float(oh * ow)
        tap_mean = acc_ref[...] * inv_hw                               # (B, 36)
        # GAP commutes with the linear stem conv: pooled == GAP(conv_stem(x)).
        pooled = jnp.dot(tap_mean, wstem_ref[...],
                         preferred_element_type=jnp.float32)           # (B, 32)
        feat = jnp.maximum(
            jnp.dot(pooled, wproj_ref[...],
                    preferred_element_type=jnp.float32), 0.0)          # (B, 1280)

        aux = aux_ref[...]                                             # (B, 5)
        b1 = scal_ref[0]
        b2 = scal_ref[1]
        w2c = scal_ref[2]

        # Heads as VPU multiply + lane reduction (weights are lane-dense rows).
        cancer = (jnp.sum(feat * w1f_ref[...], axis=1, keepdims=True)
                  + jnp.sum(aux * w1a_ref[...], axis=1, keepdims=True)
                  + b1)                                                # (B, 1)
        invasive = (jnp.sum(feat * w2f_ref[...], axis=1, keepdims=True)
                    + jnp.sum(aux * w2a_ref[...], axis=1, keepdims=True)
                    + cancer * w2c
                    + b2)                                              # (B, 1)

        out_ref[...] = jnp.concatenate([cancer, invasive], axis=1)     # (B, 2)


# ---------------------------------------------------------------------------
# Full forward (mirrors Model.forward)
# ---------------------------------------------------------------------------
def model_forward(x_nchw, aux_input, prediction_id, params, *, row_tile=16):
    del prediction_id  # unused in the PyTorch forward as well
    assert row_tile % 16 == 0  # bf16 sublane packing

    B, cin, H, W = x_nchw.shape
    oh = (H + 2 * PAD - K) // S + 1
    ow = (W + 2 * PAD - K) // S + 1

    # Pad rows to a multiple of the tile (zero rows are excluded by the masks).
    n_tiles = pl.cdiv(H, row_tile)
    h_pad = n_tiles * row_tile
    x = x_nchw
    if h_pad != H:
        x = jnp.pad(x, ((0, 0), (0, 0), (0, h_pad - H), (0, 0)))
    x = x.astype(jnp.bfloat16)  # halve HBM bytes of the only large array

    # aux: list of (B,) -> (B, 5), matching torch.cat([i.view(-1, 1)], axis=1)
    aux = jnp.concatenate([a.reshape(-1, 1) for a in aux_input], axis=1).astype(F32)

    # conv_stem weight OIHW -> (KH, KW, Cin, Cout) -> (K*K*Cin, 32); matches tap order.
    kkc = K * K * cin
    w_stem = jnp.transpose(params["stem_w"], (2, 3, 1, 0)).reshape(kkc, STEM_OUT)
    w_stem = w_stem.astype(F32)

    kernel = functools.partial(_fused_kernel, row_tile=row_tile, oh=oh, ow=ow)

    logits = pl.pallas_call(
        kernel,
        out_shape=jax.ShapeDtypeStruct((B, 2), F32),
        grid=(n_tiles,),
        in_specs=[
            pl.BlockSpec((B, cin, row_tile, W), lambda i: (0, 0, i, 0)),  # image tile
            pl.BlockSpec((kkc, STEM_OUT), lambda i: (0, 0)),              # stem weight
            pl.BlockSpec((STEM_OUT, FEAT), lambda i: (0, 0)),             # 32->1280 proj
            pl.BlockSpec((B, N_AUX), lambda i: (0, 0)),                   # aux features
            pl.BlockSpec((1, FEAT), lambda i: (0, 0)),                    # w1_feat row
            pl.BlockSpec((1, N_AUX), lambda i: (0, 0)),                   # w1_aux row
            pl.BlockSpec((1, FEAT), lambda i: (0, 0)),                    # w2_feat row
            pl.BlockSpec((1, N_AUX), lambda i: (0, 0)),                   # w2_aux row
            pl.BlockSpec(memory_space=pltpu.MemorySpace.SMEM),            # [b1, b2, w2_cancer]
        ],
        out_specs=pl.BlockSpec((B, 2), lambda i: (0, 0)),
        scratch_shapes=[pltpu.VMEM((B, kkc), F32)],                       # tap-sum accumulator
        compiler_params=pltpu.CompilerParams(
            dimension_semantics=("arbitrary",),     # single grid axis is a reduction
            vmem_limit_bytes=32 * 1024 * 1024,      # fits v7x's 64 MiB physical VMEM
        ),
    )(x, w_stem, params["proj_w"].astype(F32), aux,
      params["w1_feat"], params["w1_aux"],
      params["w2_feat"], params["w2_aux"], params["scalars"])

    cancer = logits[:, 0:1]
    invasive = logits[:, 1:2]
    return [cancer, invasive]


def init_params(key):
    ks = jax.random.split(key, 4)
    stem_w = jax.random.normal(ks[0], (STEM_OUT, IN_CH, K, K), F32) * 0.1
    proj_w = jax.random.normal(ks[1], (STEM_OUT, FEAT), F32) * 0.05
    w1 = jax.random.normal(ks[2], (1, FEAT + N_AUX), F32) * 0.02          # Linear(1285, 1)
    w2 = jax.random.normal(ks[3], (1, FEAT + N_AUX + 1), F32) * 0.02      # Linear(1286, 1)
    scalars = jnp.concatenate([
        jnp.array([0.01, -0.01], F32),                 # b1, b2
        w2[0, FEAT + N_AUX:FEAT + N_AUX + 1],          # w2_cancer (cancer-logit feedthrough)
    ])
    return {
        "stem_w": stem_w,
        "proj_w": proj_w,
        "w1_feat": w1[:, :FEAT],
        "w1_aux": w1[:, FEAT:FEAT + N_AUX],
        "w2_feat": w2[:, :FEAT],
        "w2_aux": w2[:, FEAT:FEAT + N_AUX],
        "scalars": scalars,                            # SMEM scalars
    }


if __name__ == "__main__":
    key = jax.random.PRNGKey(0)
    k_x, k_aux, k_p = jax.random.split(key, 3)

    B, H, W = 2, 32, 32
    x = jax.random.normal(k_x, (B, IN_CH, H, W), F32)       # NCHW input, like PyTorch
    aux_keys = jax.random.split(k_aux, N_AUX)
    aux_input = [jax.random.normal(ak, (B,), F32) for ak in aux_keys]
    prediction_id = jnp.arange(B, dtype=jnp.int32)

    params = init_params(k_p)

    cancer, invasive = model_forward(x, aux_input, prediction_id, params)
    jax.block_until_ready(cancer)
    jax.block_until_ready(invasive)

    assert cancer.shape == (B, 1) and invasive.shape == (B, 1)
    print("KERNEL_OK")
</pallas_src>

<mosaic_0001>
module attributes {stable_mosaic.version = 11 : i64} {
  func.func @_fused_kernel(%arg0: i32, %arg1: memref<2x4x16x32xbf16, #tpu.memory_space<vmem>>, %arg2: memref<36x32xf32, #tpu.memory_space<vmem>>, %arg3: memref<32x1280xf32, #tpu.memory_space<vmem>>, %arg4: memref<2x5xf32, #tpu.memory_space<vmem>>, %arg5: memref<1x1280xf32, #tpu.memory_space<vmem>>, %arg6: memref<1x5xf32, #tpu.memory_space<vmem>>, %arg7: memref<1x1280xf32, #tpu.memory_space<vmem>>, %arg8: memref<1x5xf32, #tpu.memory_space<vmem>>, %arg9: memref<3xf32, #tpu.memory_space<smem>>, %arg10: memref<2x2xf32, #tpu.memory_space<vmem>>, %arg11: memref<2x36xf32, #tpu.memory_space<vmem>>) attributes {dimension_semantics = [#tpu.dimension_semantics<arbitrary>], iteration_bounds = array<i64: 2>, scalar_prefetch = 0 : i64, scratch_operands = 1 : i64, tpu.core_type = #tpu.core_type<tc>, window_params = [{transform_indices = @transform_0, window_bounds = array<i64: 2, 4, 16, 32>}, {pipeline_mode = #tpu.pipeline_mode<synchronous>, transform_indices = @transform_1, window_bounds = array<i64: 36, 32>}, {pipeline_mode = #tpu.pipeline_mode<synchronous>, transform_indices = @transform_2, window_bounds = array<i64: 32, 1280>}, {pipeline_mode = #tpu.pipeline_mode<synchronous>, transform_indices = @transform_3, window_bounds = array<i64: 2, 5>}, {pipeline_mode = #tpu.pipeline_mode<synchronous>, transform_indices = @transform_4, window_bounds = array<i64: 1, 1280>}, {pipeline_mode = #tpu.pipeline_mode<synchronous>, transform_indices = @transform_5, window_bounds = array<i64: 1, 5>}, {pipeline_mode = #tpu.pipeline_mode<synchronous>, transform_indices = @transform_6, window_bounds = array<i64: 1, 1280>}, {pipeline_mode = #tpu.pipeline_mode<synchronous>, transform_indices = @transform_7, window_bounds = array<i64: 1, 5>}, {transform_indices = @transform_8, window_bounds = array<i64: 3>}, {pipeline_mode = #tpu.pipeline_mode<synchronous>, transform_indices = @transform_9, window_bounds = array<i64: 2, 2>}]} {
    %c0_i32 = arith.constant 0 : i32
    %0 = arith.cmpi eq, %arg0, %c0_i32 : i32
    %1 = arith.extui %0 : i1 to i32
    %c0_i32_0 = arith.constant 0 : i32
    %2 = arith.cmpi ne, %1, %c0_i32_0 : i32
    scf.if %2 {
      %cst_126 = arith.constant 0.000000e+00 : f32
      %381 = vector.broadcast %cst_126 : f32 to vector<2x36xf32>
      %c0_127 = arith.constant 0 : index
      %c0_128 = arith.constant 0 : index
      %382 = vector.load %arg11[%c0_127, %c0_128] : memref<2x36xf32, #tpu.memory_space<vmem>>, vector<2x36xf32>
      tpu.vector_store %arg11[%c0_127, %c0_128], %381 {strides = array<i32>} : memref<2x36xf32, #tpu.memory_space<vmem>>, vector<2x36xf32>,
    } else {
    }
    %c0 = arith.constant 0 : index
    %c0_1 = arith.constant 0 : index
    %c0_2 = arith.constant 0 : index
    %c0_3 = arith.constant 0 : index
    %3 = vector.load %arg1[%c0, %c0_1, %c0_2, %c0_3] : memref<2x4x16x32xbf16, #tpu.memory_space<vmem>>, vector<2x4x16x32xbf16>
    %4 = arith.extf %3 : vector<2x4x16x32xbf16> to vector<2x4x16x32xf32>
    %5 = tpu.iota {dimensions = array<i32: 0>} : vector<16x1xi32>
    %c16_i32 = arith.constant 16 : i32
    %6 = arith.muli %arg0, %c16_i32 : i32
    %7 = vector.broadcast %6 : i32 to vector<16x1xi32>
    %8 = arith.addi %5, %7 : vector<16x1xi32>
    %c1_i32 = arith.constant 1 : i32
    %9 = vector.broadcast %c1_i32 : i32 to vector<16x1xi32>
    %10 = arith.addi %8, %9 : vector<16x1xi32>
    %11 = tpu.iota {dimensions = array<i32: 1>} : vector<1x32xi32>
    %c1_i32_4 = arith.constant 1 : i32
    %12 = vector.broadcast %c1_i32_4 : i32 to vector<1x32xi32>
    %13 = arith.addi %11, %12 : vector<1x32xi32>
    %c0_i32_5 = arith.constant 0 : i32
    %14 = vector.broadcast %c0_i32_5 : i32 to vector<16x1xi32>
    %15 = arith.cmpi sge, %10, %14 : vector<16x1xi32>
    %c32_i32 = arith.constant 32 : i32
    %16 = vector.broadcast %c32_i32 : i32 to vector<16x1xi32>
    %17 = arith.cmpi slt, %10, %16 : vector<16x1xi32>
    %18 = arith.andi %15, %17 : vector<16x1xi1>
    %c2_i32 = arith.constant 2 : i32
    %c0_i32_6 = arith.constant 0 : i32
    %19 = arith.cmpi eq, %c2_i32, %c0_i32_6 : i32
    %c1_i32_7 = arith.constant 1 : i32
    %20 = arith.select %19, %c1_i32_7, %c2_i32 : i32
    %21 = vector.broadcast %20 : i32 to vector<16x1xi32>
    %22 = arith.remsi %10, %21 : vector<16x1xi32>
    %c0_i32_8 = arith.constant 0 : i32
    %23 = vector.broadcast %c0_i32_8 : i32 to vector<16x1xi32>
    %24 = arith.cmpi ne, %22, %23 : vector<16x1xi32>
    %c0_i32_9 = arith.constant 0 : i32
    %25 = vector.broadcast %c0_i32_9 : i32 to vector<16x1xi32>
    %26 = arith.cmpi slt, %22, %25 : vector<16x1xi32>
    %c0_i32_10 = arith.constant 0 : i32
    %27 = arith.cmpi slt, %20, %c0_i32_10 : i32
    %28 = vector.broadcast %27 : i1 to vector<16x1xi1>
    %29 = vector.broadcast %28 : vector<16x1xi1> to vector<16x1xi1>
    %30 = arith.xori %26, %29 : vector<16x1xi1>
    %31 = arith.andi %30, %24 : vector<16x1xi1>
    %32 = vector.broadcast %20 : i32 to vector<16x1xi32>
    %33 = arith.addi %22, %32 : vector<16x1xi32>
    %34 = arith.select %31, %33, %22 : vector<16x1xi1>, vector<16x1xi32>
    %c0_i32_11 = arith.constant 0 : i32
    %35 = vector.broadcast %c0_i32_11 : i32 to vector<16x1xi32>
    %36 = arith.cmpi eq, %34, %35 : vector<16x1xi32>
    %37 = arith.andi %18, %36 : vector<16x1xi1>
    %38 = arith.extui %37 : vector<16x1xi1> to vector<16x1xi32>
    %39 = arith.sitofp %38 : vector<16x1xi32> to vector<16x1xf32>
    %40 = vector.shape_cast %39 : vector<16x1xf32> to vector<1x1x16x1xf32>
    %41 = vector.broadcast %40 : vector<1x1x16x1xf32> to vector<2x4x16x32xf32>
    %42 = arith.mulf %4, %41 : vector<2x4x16x32xf32>
    %cst = arith.constant dense<0.000000e+00> : vector<2x4x32xf32>
    %43 = vector.multi_reduction <add>, %42, %cst [2] : vector<2x4x16x32xf32> to vector<2x4x32xf32>
    %c1_i32_12 = arith.constant 1 : i32
    %44 = vector.broadcast %c1_i32_12 : i32 to vector<16x1xi32>
    %45 = arith.cmpi sge, %10, %44 : vector<16x1xi32>
    %c33_i32 = arith.constant 33 : i32
    %46 = vector.broadcast %c33_i32 : i32 to vector<16x1xi32>
    %47 = arith.cmpi slt, %10, %46 : vector<16x1xi32>
    %48 = arith.andi %45, %47 : vector<16x1xi1>
    %c2_i32_13 = arith.constant 2 : i32
    %c0_i32_14 = arith.constant 0 : i32
    %49 = arith.cmpi eq, %c2_i32_13, %c0_i32_14 : i32
    %c1_i32_15 = arith.constant 1 : i32
    %50 = arith.select %49, %c1_i32_15, %c2_i32_13 : i32
    %51 = vector.broadcast %50 : i32 to vector<16x1xi32>
    %52 = arith.remsi %10, %51 : vector<16x1xi32>
    %c0_i32_16 = arith.constant 0 : i32
    %53 = vector.broadcast %c0_i32_16 : i32 to vector<16x1xi32>
    %54 = arith.cmpi ne, %52, %53 : vector<16x1xi32>
    %c0_i32_17 = arith.constant 0 : i32
    %55 = vector.broadcast %c0_i32_17 : i32 to vector<16x1xi32>
    %56 = arith.cmpi slt, %52, %55 : vector<16x1xi32>
    %c0_i32_18 = arith.constant 0 : i32
    %57 = arith.cmpi slt, %50, %c0_i32_18 : i32
    %58 = vector.broadcast %57 : i1 to vector<16x1xi1>
    %59 = vector.broadcast %58 : vector<16x1xi1> to vector<16x1xi1>
    %60 = arith.xori %56, %59 : vector<16x1xi1>
    %61 = arith.andi %60, %54 : vector<16x1xi1>
    %62 = vector.broadcast %50 : i32 to vector<16x1xi32>
    %63 = arith.addi %52, %62 : vector<16x1xi32>
    %64 = arith.select %61, %63, %52 : vector<16x1xi1>, vector<16x1xi32>
    %c1_i32_19 = arith.constant 1 : i32
    %65 = vector.broadcast %c1_i32_19 : i32 to vector<16x1xi32>
    %66 = arith.cmpi eq, %64, %65 : vector<16x1xi32>
    %67 = arith.andi %48, %66 : vector<16x1xi1>
    %68 = arith.extui %67 : vector<16x1xi1> to vector<16x1xi32>
    %69 = arith.sitofp %68 : vector<16x1xi32> to vector<16x1xf32>
    %70 = vector.shape_cast %69 : vector<16x1xf32> to vector<1x1x16x1xf32>
    %71 = vector.broadcast %70 : vector<1x1x16x1xf32> to vector<2x4x16x32xf32>
    %72 = arith.mulf %4, %71 : vector<2x4x16x32xf32>
    %cst_20 = arith.constant dense<0.000000e+00> : vector<2x4x32xf32>
    %73 = vector.multi_reduction <add>, %72, %cst_20 [2] : vector<2x4x16x32xf32> to vector<2x4x32xf32>
    %c2_i32_21 = arith.constant 2 : i32
    %74 = vector.broadcast %c2_i32_21 : i32 to vector<16x1xi32>
    %75 = arith.cmpi sge, %10, %74 : vector<16x1xi32>
    %c34_i32 = arith.constant 34 : i32
    %76 = vector.broadcast %c34_i32 : i32 to vector<16x1xi32>
    %77 = arith.cmpi slt, %10, %76 : vector<16x1xi32>
    %78 = arith.andi %75, %77 : vector<16x1xi1>
    %c2_i32_22 = arith.constant 2 : i32
    %c0_i32_23 = arith.constant 0 : i32
    %79 = arith.cmpi eq, %c2_i32_22, %c0_i32_23 : i32
    %c1_i32_24 = arith.constant 1 : i32
    %80 = arith.select %79, %c1_i32_24, %c2_i32_22 : i32
    %81 = vector.broadcast %80 : i32 to vector<16x1xi32>
    %82 = arith.remsi %10, %81 : vector<16x1xi32>
    %c0_i32_25 = arith.constant 0 : i32
    %83 = vector.broadcast %c0_i32_25 : i32 to vector<16x1xi32>
    %84 = arith.cmpi ne, %82, %83 : vector<16x1xi32>
    %c0_i32_26 = arith.constant 0 : i32
    %85 = vector.broadcast %c0_i32_26 : i32 to vector<16x1xi32>
    %86 = arith.cmpi slt, %82, %85 : vector<16x1xi32>
    %c0_i32_27 = arith.constant 0 : i32
    %87 = arith.cmpi slt, %80, %c0_i32_27 : i32
    %88 = vector.broadcast %87 : i1 to vector<16x1xi1>
    %89 = vector.broadcast %88 : vector<16x1xi1> to vector<16x1xi1>
    %90 = arith.xori %86, %89 : vector<16x1xi1>
    %91 = arith.andi %90, %84 : vector<16x1xi1>
    %92 = vector.broadcast %80 : i32 to vector<16x1xi32>
    %93 = arith.addi %82, %92 : vector<16x1xi32>
    %94 = arith.select %91, %93, %82 : vector<16x1xi1>, vector<16x1xi32>
    %c0_i32_28 = arith.constant 0 : i32
    %95 = vector.broadcast %c0_i32_28 : i32 to vector<16x1xi32>
    %96 = arith.cmpi eq, %94, %95 : vector<16x1xi32>
    %97 = arith.andi %78, %96 : vector<16x1xi1>
    %98 = arith.extui %97 : vector<16x1xi1> to vector<16x1xi32>
    %99 = arith.sitofp %98 : vector<16x1xi32> to vector<16x1xf32>
    %100 = vector.shape_cast %99 : vector<16x1xf32> to vector<1x1x16x1xf32>
    %101 = vector.broadcast %100 : vector<1x1x16x1xf32> to vector<2x4x16x32xf32>
    %102 = arith.mulf %4, %101 : vector<2x4x16x32xf32>
    %cst_29 = arith.constant dense<0.000000e+00> : vector<2x4x32xf32>
    %103 = vector.multi_reduction <add>, %102, %cst_29 [2] : vector<2x4x16x32xf32> to vector<2x4x32xf32>
    %c0_i32_30 = arith.constant 0 : i32
    %104 = vector.broadcast %c0_i32_30 : i32 to vector<1x32xi32>
    %105 = arith.cmpi sge, %13, %104 : vector<1x32xi32>
    %c32_i32_31 = arith.constant 32 : i32
    %106 = vector.broadcast %c32_i32_31 : i32 to vector<1x32xi32>
    %107 = arith.cmpi slt, %13, %106 : vector<1x32xi32>
    %108 = arith.andi %105, %107 : vector<1x32xi1>
    %c2_i32_32 = arith.constant 2 : i32
    %c0_i32_33 = arith.constant 0 : i32
    %109 = arith.cmpi eq, %c2_i32_32, %c0_i32_33 : i32
    %c1_i32_34 = arith.constant 1 : i32
    %110 = arith.select %109, %c1_i32_34, %c2_i32_32 : i32
    %111 = vector.broadcast %110 : i32 to vector<1x32xi32>
    %112 = arith.remsi %13, %111 : vector<1x32xi32>
    %c0_i32_35 = arith.constant 0 : i32
    %113 = vector.broadcast %c0_i32_35 : i32 to vector<1x32xi32>
    %114 = arith.cmpi ne, %112, %113 : vector<1x32xi32>
    %c0_i32_36 = arith.constant 0 : i32
    %115 = vector.broadcast %c0_i32_36 : i32 to vector<1x32xi32>
    %116 = arith.cmpi slt, %112, %115 : vector<1x32xi32>
    %c0_i32_37 = arith.constant 0 : i32
    %117 = arith.cmpi slt, %110, %c0_i32_37 : i32
    %118 = vector.broadcast %117 : i1 to vector<1x32xi1>
    %119 = vector.broadcast %118 : vector<1x32xi1> to vector<1x32xi1>
    %120 = arith.xori %116, %119 : vector<1x32xi1>
    %121 = arith.andi %120, %114 : vector<1x32xi1>
    %122 = vector.broadcast %110 : i32 to vector<1x32xi32>
    %123 = arith.addi %112, %122 : vector<1x32xi32>
    %124 = arith.select %121, %123, %112 : vector<1x32xi1>, vector<1x32xi32>
    %c0_i32_38 = arith.constant 0 : i32
    %125 = vector.broadcast %c0_i32_38 : i32 to vector<1x32xi32>
    %126 = arith.cmpi eq, %124, %125 : vector<1x32xi32>
    %127 = arith.andi %108, %126 : vector<1x32xi1>
    %128 = arith.extui %127 : vector<1x32xi1> to vector<1x32xi32>
    %129 = arith.sitofp %128 : vector<1x32xi32> to vector<1x32xf32>
    %130 = vector.shape_cast %129 : vector<1x32xf32> to vector<1x1x32xf32>
    %131 = vector.broadcast %130 : vector<1x1x32xf32> to vector<2x4x32xf32>
    %132 = arith.mulf %43, %131 : vector<2x4x32xf32>
    %cst_39 = arith.constant dense<0.000000e+00> : vector<2x4xf32>
    %133 = vector.multi_reduction <add>, %132, %cst_39 [2] : vector<2x4x32xf32> to vector<2x4xf32>
    %c1_i32_40 = arith.constant 1 : i32
    %134 = vector.broadcast %c1_i32_40 : i32 to vector<1x32xi32>
    %135 = arith.cmpi sge, %13, %134 : vector<1x32xi32>
    %c33_i32_41 = arith.constant 33 : i32
    %136 = vector.broadcast %c33_i32_41 : i32 to vector<1x32xi32>
    %137 = arith.cmpi slt, %13, %136 : vector<1x32xi32>
    %138 = arith.andi %135, %137 : vector<1x32xi1>
    %c2_i32_42 = arith.constant 2 : i32
    %c0_i32_43 = arith.constant 0 : i32
    %139 = arith.cmpi eq, %c2_i32_42, %c0_i32_43 : i32
    %c1_i32_44 = arith.constant 1 : i32
    %140 = arith.select %139, %c1_i32_44, %c2_i32_42 : i32
    %141 = vector.broadcast %140 : i32 to vector<1x32xi32>
    %142 = arith.remsi %13, %141 : vector<1x32xi32>
    %c0_i32_45 = arith.constant 0 : i32
    %143 = vector.broadcast %c0_i32_45 : i32 to vector<1x32xi32>
    %144 = arith.cmpi ne, %142, %143 : vector<1x32xi32>
    %c0_i32_46 = arith.constant 0 : i32
    %145 = vector.broadcast %c0_i32_46 : i32 to vector<1x32xi32>
    %146 = arith.cmpi slt, %142, %145 : vector<1x32xi32>
    %c0_i32_47 = arith.constant 0 : i32
    %147 = arith.cmpi slt, %140, %c0_i32_47 : i32
    %148 = vector.broadcast %147 : i1 to vector<1x32xi1>
    %149 = vector.broadcast %148 : vector<1x32xi1> to vector<1x32xi1>
    %150 = arith.xori %146, %149 : vector<1x32xi1>
    %151 = arith.andi %150, %144 : vector<1x32xi1>
    %152 = vector.broadcast %140 : i32 to vector<1x32xi32>
    %153 = arith.addi %142, %152 : vector<1x32xi32>
    %154 = arith.select %151, %153, %142 : vector<1x32xi1>, vector<1x32xi32>
    %c1_i32_48 = arith.constant 1 : i32
    %155 = vector.broadcast %c1_i32_48 : i32 to vector<1x32xi32>
    %156 = arith.cmpi eq, %154, %155 : vector<1x32xi32>
    %157 = arith.andi %138, %156 : vector<1x32xi1>
    %158 = arith.extui %157 : vector<1x32xi1> to vector<1x32xi32>
    %159 = arith.sitofp %158 : vector<1x32xi32> to vector<1x32xf32>
    %160 = vector.shape_cast %159 : vector<1x32xf32> to vector<1x1x32xf32>
    %161 = vector.broadcast %160 : vector<1x1x32xf32> to vector<2x4x32xf32>
    %162 = arith.mulf %43, %161 : vector<2x4x32xf32>
    %cst_49 = arith.constant dense<0.000000e+00> : vector<2x4xf32>
    %163 = vector.multi_reduction <add>, %162, %cst_49 [2] : vector<2x4x32xf32> to vector<2x4xf32>
    %c2_i32_50 = arith.constant 2 : i32
    %164 = vector.broadcast %c2_i32_50 : i32 to vector<1x32xi32>
    %165 = arith.cmpi sge, %13, %164 : vector<1x32xi32>
    %c34_i32_51 = arith.constant 34 : i32
    %166 = vector.broadcast %c34_i32_51 : i32 to vector<1x32xi32>
    %167 = arith.cmpi slt, %13, %166 : vector<1x32xi32>
    %168 = arith.andi %165, %167 : vector<1x32xi1>
    %c2_i32_52 = arith.constant 2 : i32
    %c0_i32_53 = arith.constant 0 : i32
    %169 = arith.cmpi eq, %c2_i32_52, %c0_i32_53 : i32
    %c1_i32_54 = arith.constant 1 : i32
    %170 = arith.select %169, %c1_i32_54, %c2_i32_52 : i32
    %171 = vector.broadcast %170 : i32 to vector<1x32xi32>
    %172 = arith.remsi %13, %171 : vector<1x32xi32>
    %c0_i32_55 = arith.constant 0 : i32
    %173 = vector.broadcast %c0_i32_55 : i32 to vector<1x32xi32>
    %174 = arith.cmpi ne, %172, %173 : vector<1x32xi32>
    %c0_i32_56 = arith.constant 0 : i32
    %175 = vector.broadcast %c0_i32_56 : i32 to vector<1x32xi32>
    %176 = arith.cmpi slt, %172, %175 : vector<1x32xi32>
    %c0_i32_57 = arith.constant 0 : i32
    %177 = arith.cmpi slt, %170, %c0_i32_57 : i32
    %178 = vector.broadcast %177 : i1 to vector<1x32xi1>
    %179 = vector.broadcast %178 : vector<1x32xi1> to vector<1x32xi1>
    %180 = arith.xori %176, %179 : vector<1x32xi1>
    %181 = arith.andi %180, %174 : vector<1x32xi1>
    %182 = vector.broadcast %170 : i32 to vector<1x32xi32>
    %183 = arith.addi %172, %182 : vector<1x32xi32>
    %184 = arith.select %181, %183, %172 : vector<1x32xi1>, vector<1x32xi32>
    %c0_i32_58 = arith.constant 0 : i32
    %185 = vector.broadcast %c0_i32_58 : i32 to vector<1x32xi32>
    %186 = arith.cmpi eq, %184, %185 : vector<1x32xi32>
    %187 = arith.andi %168, %186 : vector<1x32xi1>
    %188 = arith.extui %187 : vector<1x32xi1> to vector<1x32xi32>
    %189 = arith.sitofp %188 : vector<1x32xi32> to vector<1x32xf32>
    %190 = vector.shape_cast %189 : vector<1x32xf32> to vector<1x1x32xf32>
    %191 = vector.broadcast %190 : vector<1x1x32xf32> to vector<2x4x32xf32>
    %192 = arith.mulf %43, %191 : vector<2x4x32xf32>
    %cst_59 = arith.constant dense<0.000000e+00> : vector<2x4xf32>
    %193 = vector.multi_reduction <add>, %192, %cst_59 [2] : vector<2x4x32xf32> to vector<2x4xf32>
    %c0_i32_60 = arith.constant 0 : i32
    %194 = vector.broadcast %c0_i32_60 : i32 to vector<1x32xi32>
    %195 = arith.cmpi sge, %13, %194 : vector<1x32xi32>
    %c32_i32_61 = arith.constant 32 : i32
    %196 = vector.broadcast %c32_i32_61 : i32 to vector<1x32xi32>
    %197 = arith.cmpi slt, %13, %196 : vector<1x32xi32>
    %198 = arith.andi %195, %197 : vector<1x32xi1>
    %c2_i32_62 = arith.constant 2 : i32
    %c0_i32_63 = arith.constant 0 : i32
    %199 = arith.cmpi eq, %c2_i32_62, %c0_i32_63 : i32
    %c1_i32_64 = arith.constant 1 : i32
    %200 = arith.select %199, %c1_i32_64, %c2_i32_62 : i32
    %201 = vector.broadcast %200 : i32 to vector<1x32xi32>
    %202 = arith.remsi %13, %201 : vector<1x32xi32>
    %c0_i32_65 = arith.constant 0 : i32
    %203 = vector.broadcast %c0_i32_65 : i32 to vector<1x32xi32>
    %204 = arith.cmpi ne, %202, %203 : vector<1x32xi32>
    %c0_i32_66 = arith.constant 0 : i32
    %205 = vector.broadcast %c0_i32_66 : i32 to vector<1x32xi32>
    %206 = arith.cmpi slt, %202, %205 : vector<1x32xi32>
    %c0_i32_67 = arith.constant 0 : i32
    %207 = arith.cmpi slt, %200, %c0_i32_67 : i32
    %208 = vector.broadcast %207 : i1 to vector<1x32xi1>
    %209 = vector.broadcast %208 : vector<1x32xi1> to vector<1x32xi1>
    %210 = arith.xori %206, %209 : vector<1x32xi1>
    %211 = arith.andi %210, %204 : vector<1x32xi1>
    %212 = vector.broadcast %200 : i32 to vector<1x32xi32>
    %213 = arith.addi %202, %212 : vector<1x32xi32>
    %214 = arith.select %211, %213, %202 : vector<1x32xi1>, vector<1x32xi32>
    %c0_i32_68 = arith.constant 0 : i32
    %215 = vector.broadcast %c0_i32_68 : i32 to vector<1x32xi32>
    %216 = arith.cmpi eq, %214, %215 : vector<1x32xi32>
    %217 = arith.andi %198, %216 : vector<1x32xi1>
    %218 = arith.extui %217 : vector<1x32xi1> to vector<1x32xi32>
    %219 = arith.sitofp %218 : vector<1x32xi32> to vector<1x32xf32>
    %220 = vector.shape_cast %219 : vector<1x32xf32> to vector<1x1x32xf32>
    %221 = vector.broadcast %220 : vector<1x1x32xf32> to vector<2x4x32xf32>
    %222 = arith.mulf %73, %221 : vector<2x4x32xf32>
    %cst_69 = arith.constant dense<0.000000e+00> : vector<2x4xf32>
    %223 = vector.multi_reduction <add>, %222, %cst_69 [2] : vector<2x4x32xf32> to vector<2x4xf32>
    %c1_i32_70 = arith.constant 1 : i32
    %224 = vector.broadcast %c1_i32_70 : i32 to vector<1x32xi32>
    %225 = arith.cmpi sge, %13, %224 : vector<1x32xi32>
    %c33_i32_71 = arith.constant 33 : i32
    %226 = vector.broadcast %c33_i32_71 : i32 to vector<1x32xi32>
    %227 = arith.cmpi slt, %13, %226 : vector<1x32xi32>
    %228 = arith.andi %225, %227 : vector<1x32xi1>
    %c2_i32_72 = arith.constant 2 : i32
    %c0_i32_73 = arith.constant 0 : i32
    %229 = arith.cmpi eq, %c2_i32_72, %c0_i32_73 : i32
    %c1_i32_74 = arith.constant 1 : i32
    %230 = arith.select %229, %c1_i32_74, %c2_i32_72 : i32
    %231 = vector.broadcast %230 : i32 to vector<1x32xi32>
    %232 = arith.remsi %13, %231 : vector<1x32xi32>
    %c0_i32_75 = arith.constant 0 : i32
    %233 = vector.broadcast %c0_i32_75 : i32 to vector<1x32xi32>
    %234 = arith.cmpi ne, %232, %233 : vector<1x32xi32>
    %c0_i32_76 = arith.constant 0 : i32
    %235 = vector.broadcast %c0_i32_76 : i32 to vector<1x32xi32>
    %236 = arith.cmpi slt, %232, %235 : vector<1x32xi32>
    %c0_i32_77 = arith.constant 0 : i32
    %237 = arith.cmpi slt, %230, %c0_i32_77 : i32
    %238 = vector.broadcast %237 : i1 to vector<1x32xi1>
    %239 = vector.broadcast %238 : vector<1x32xi1> to vector<1x32xi1>
    %240 = arith.xori %236, %239 : vector<1x32xi1>
    %241 = arith.andi %240, %234 : vector<1x32xi1>
    %242 = vector.broadcast %230 : i32 to vector<1x32xi32>
    %243 = arith.addi %232, %242 : vector<1x32xi32>
    %244 = arith.select %241, %243, %232 : vector<1x32xi1>, vector<1x32xi32>
    %c1_i32_78 = arith.constant 1 : i32
    %245 = vector.broadcast %c1_i32_78 : i32 to vector<1x32xi32>
    %246 = arith.cmpi eq, %244, %245 : vector<1x32xi32>
    %247 = arith.andi %228, %246 : vector<1x32xi1>
    %248 = arith.extui %247 : vector<1x32xi1> to vector<1x32xi32>
    %249 = arith.sitofp %248 : vector<1x32xi32> to vector<1x32xf32>
    %250 = vector.shape_cast %249 : vector<1x32xf32> to vector<1x1x32xf32>
    %251 = vector.broadcast %250 : vector<1x1x32xf32> to vector<2x4x32xf32>
    %252 = arith.mulf %73, %251 : vector<2x4x32xf32>
    %cst_79 = arith.constant dense<0.000000e+00> : vector<2x4xf32>
    %253 = vector.multi_reduction <add>, %252, %cst_79 [2] : vector<2x4x32xf32> to vector<2x4xf32>
    %c2_i32_80 = arith.constant 2 : i32
    %254 = vector.broadcast %c2_i32_80 : i32 to vector<1x32xi32>
    %255 = arith.cmpi sge, %13, %254 : vector<1x32xi32>
    %c34_i32_81 = arith.constant 34 : i32
    %256 = vector.broadcast %c34_i32_81 : i32 to vector<1x32xi32>
    %257 = arith.cmpi slt, %13, %256 : vector<1x32xi32>
    %258 = arith.andi %255, %257 : vector<1x32xi1>
    %c2_i32_82 = arith.constant 2 : i32
    %c0_i32_83 = arith.constant 0 : i32
    %259 = arith.cmpi eq, %c2_i32_82, %c0_i32_83 : i32
    %c1_i32_84 = arith.constant 1 : i32
    %260 = arith.select %259, %c1_i32_84, %c2_i32_82 : i32
    %261 = vector.broadcast %260 : i32 to vector<1x32xi32>
    %262 = arith.remsi %13, %261 : vector<1x32xi32>
    %c0_i32_85 = arith.constant 0 : i32
    %263 = vector.broadcast %c0_i32_85 : i32 to vector<1x32xi32>
    %264 = arith.cmpi ne, %262, %263 : vector<1x32xi32>
    %c0_i32_86 = arith.constant 0 : i32
    %265 = vector.broadcast %c0_i32_86 : i32 to vector<1x32xi32>
    %266 = arith.cmpi slt, %262, %265 : vector<1x32xi32>
    %c0_i32_87 = arith.constant 0 : i32
    %267 = arith.cmpi slt, %260, %c0_i32_87 : i32
    %268 = vector.broadcast %267 : i1 to vector<1x32xi1>
    %269 = vector.broadcast %268 : vector<1x32xi1> to vector<1x32xi1>
    %270 = arith.xori %266, %269 : vector<1x32xi1>
    %271 = arith.andi %270, %264 : vector<1x32xi1>
    %272 = vector.broadcast %260 : i32 to vector<1x32xi32>
    %273 = arith.addi %262, %272 : vector<1x32xi32>
    %274 = arith.select %271, %273, %262 : vector<1x32xi1>, vector<1x32xi32>
    %c0_i32_88 = arith.constant 0 : i32
    %275 = vector.broadcast %c0_i32_88 : i32 to vector<1x32xi32>
    %276 = arith.cmpi eq, %274, %275 : vector<1x32xi32>
    %277 = arith.andi %258, %276 : vector<1x32xi1>
    %278 = arith.extui %277 : vector<1x32xi1> to vector<1x32xi32>
    %279 = arith.sitofp %278 : vector<1x32xi32> to vector<1x32xf32>
    %280 = vector.shape_cast %279 : vector<1x32xf32> to vector<1x1x32xf32>
    %281 = vector.broadcast %280 : vector<1x1x32xf32> to vector<2x4x32xf32>
    %282 = arith.mulf %73, %281 : vector<2x4x32xf32>
    %cst_89 = arith.constant dense<0.000000e+00> : vector<2x4xf32>
    %283 = vector.multi_reduction <add>, %282, %cst_89 [2] : vector<2x4x32xf32> to vector<2x4xf32>
    %c0_i32_90 = arith.constant 0 : i32
    %284 = vector.broadcast %c0_i32_90 : i32 to vector<1x32xi32>
    %285 = arith.cmpi sge, %13, %284 : vector<1x32xi32>
    %c32_i32_91 = arith.constant 32 : i32
    %286 = vector.broadcast %c32_i32_91 : i32 to vector<1x32xi32>
    %287 = arith.cmpi slt, %13, %286 : vector<1x32xi32>
    %288 = arith.andi %285, %287 : vector<1x32xi1>
    %c2_i32_92 = arith.constant 2 : i32
    %c0_i32_93 = arith.constant 0 : i32
    %289 = arith.cmpi eq, %c2_i32_92, %c0_i32_93 : i32
    %c1_i32_94 = arith.constant 1 : i32
    %290 = arith.select %289, %c1_i32_94, %c2_i32_92 : i32
    %291 = vector.broadcast %290 : i32 to vector<1x32xi32>
    %292 = arith.remsi %13, %291 : vector<1x32xi32>
    %c0_i32_95 = arith.constant 0 : i32
    %293 = vector.broadcast %c0_i32_95 : i32 to vector<1x32xi32>
    %294 = arith.cmpi ne, %292, %293 : vector<1x32xi32>
    %c0_i32_96 = arith.constant 0 : i32
    %295 = vector.broadcast %c0_i32_96 : i32 to vector<1x32xi32>
    %296 = arith.cmpi slt, %292, %295 : vector<1x32xi32>
    %c0_i32_97 = arith.constant 0 : i32
    %297 = arith.cmpi slt, %290, %c0_i32_97 : i32
    %298 = vector.broadcast %297 : i1 to vector<1x32xi1>
    %299 = vector.broadcast %298 : vector<1x32xi1> to vector<1x32xi1>
    %300 = arith.xori %296, %299 : vector<1x32xi1>
    %301 = arith.andi %300, %294 : vector<1x32xi1>
    %302 = vector.broadcast %290 : i32 to vector<1x32xi32>
    %303 = arith.addi %292, %302 : vector<1x32xi32>
    %304 = arith.select %301, %303, %292 : vector<1x32xi1>, vector<1x32xi32>
    %c0_i32_98 = arith.constant 0 : i32
    %305 = vector.broadcast %c0_i32_98 : i32 to vector<1x32xi32>
    %306 = arith.cmpi eq, %304, %305 : vector<1x32xi32>
    %307 = arith.andi %288, %306 : vector<1x32xi1>
    %308 = arith.extui %307 : vector<1x32xi1> to vector<1x32xi32>
    %309 = arith.sitofp %308 : vector<1x32xi32> to vector<1x32xf32>
    %310 = vector.shape_cast %309 : vector<1x32xf32> to vector<1x1x32xf32>
    %311 = vector.broadcast %310 : vector<1x1x32xf32> to vector<2x4x32xf32>
    %312 = arith.mulf %103, %311 : vector<2x4x32xf32>
    %cst_99 = arith.constant dense<0.000000e+00> : vector<2x4xf32>
    %313 = vector.multi_reduction <add>, %312, %cst_99 [2] : vector<2x4x32xf32> to vector<2x4xf32>
    %c1_i32_100 = arith.constant 1 : i32
    %314 = vector.broadcast %c1_i32_100 : i32 to vector<1x32xi32>
    %315 = arith.cmpi sge, %13, %314 : vector<1x32xi32>
    %c33_i32_101 = arith.constant 33 : i32
    %316 = vector.broadcast %c33_i32_101 : i32 to vector<1x32xi32>
    %317 = arith.cmpi slt, %13, %316 : vector<1x32xi32>
    %318 = arith.andi %315, %317 : vector<1x32xi1>
    %c2_i32_102 = arith.constant 2 : i32
    %c0_i32_103 = arith.constant 0 : i32
    %319 = arith.cmpi eq, %c2_i32_102, %c0_i32_103 : i32
    %c1_i32_104 = arith.constant 1 : i32
    %320 = arith.select %319, %c1_i32_104, %c2_i32_102 : i32
    %321 = vector.broadcast %320 : i32 to vector<1x32xi32>
    %322 = arith.remsi %13, %321 : vector<1x32xi32>
    %c0_i32_105 = arith.constant 0 : i32
    %323 = vector.broadcast %c0_i32_105 : i32 to vector<1x32xi32>
    %324 = arith.cmpi ne, %322, %323 : vector<1x32xi32>
    %c0_i32_106 = arith.constant 0 : i32
    %325 = vector.broadcast %c0_i32_106 : i32 to vector<1x32xi32>
    %326 = arith.cmpi slt, %322, %325 : vector<1x32xi32>
    %c0_i32_107 = arith.constant 0 : i32
    %327 = arith.cmpi slt, %320, %c0_i32_107 : i32
    %328 = vector.broadcast %327 : i1 to vector<1x32xi1>
    %329 = vector.broadcast %328 : vector<1x32xi1> to vector<1x32xi1>
    %330 = arith.xori %326, %329 : vector<1x32xi1>
    %331 = arith.andi %330, %324 : vector<1x32xi1>
    %332 = vector.broadcast %320 : i32 to vector<1x32xi32>
    %333 = arith.addi %322, %332 : vector<1x32xi32>
    %334 = arith.select %331, %333, %322 : vector<1x32xi1>, vector<1x32xi32>
    %c1_i32_108 = arith.constant 1 : i32
    %335 = vector.broadcast %c1_i32_108 : i32 to vector<1x32xi32>
    %336 = arith.cmpi eq, %334, %335 : vector<1x32xi32>
    %337 = arith.andi %318, %336 : vector<1x32xi1>
    %338 = arith.extui %337 : vector<1x32xi1> to vector<1x32xi32>
    %339 = arith.sitofp %338 : vector<1x32xi32> to vector<1x32xf32>
    %340 = vector.shape_cast %339 : vector<1x32xf32> to vector<1x1x32xf32>
    %341 = vector.broadcast %340 : vector<1x1x32xf32> to vector<2x4x32xf32>
    %342 = arith.mulf %103, %341 : vector<2x4x32xf32>
    %cst_109 = arith.constant dense<0.000000e+00> : vector<2x4xf32>
    %343 = vector.multi_reduction <add>, %342, %cst_109 [2] : vector<2x4x32xf32> to vector<2x4xf32>
    %c2_i32_110 = arith.constant 2 : i32
    %344 = vector.broadcast %c2_i32_110 : i32 to vector<1x32xi32>
    %345 = arith.cmpi sge, %13, %344 : vector<1x32xi32>
    %c34_i32_111 = arith.constant 34 : i32
    %346 = vector.broadcast %c34_i32_111 : i32 to vector<1x32xi32>
    %347 = arith.cmpi slt, %13, %346 : vector<1x32xi32>
    %348 = arith.andi %345, %347 : vector<1x32xi1>
    %c2_i32_112 = arith.constant 2 : i32
    %c0_i32_113 = arith.constant 0 : i32
    %349 = arith.cmpi eq, %c2_i32_112, %c0_i32_113 : i32
    %c1_i32_114 = arith.constant 1 : i32
    %350 = arith.select %349, %c1_i32_114, %c2_i32_112 : i32
    %351 = vector.broadcast %350 : i32 to vector<1x32xi32>
    %352 = arith.remsi %13, %351 : vector<1x32xi32>
    %c0_i32_115 = arith.constant 0 : i32
    %353 = vector.broadcast %c0_i32_115 : i32 to vector<1x32xi32>
    %354 = arith.cmpi ne, %352, %353 : vector<1x32xi32>
    %c0_i32_116 = arith.constant 0 : i32
    %355 = vector.broadcast %c0_i32_116 : i32 to vector<1x32xi32>
    %356 = arith.cmpi slt, %352, %355 : vector<1x32xi32>
    %c0_i32_117 = arith.constant 0 : i32
    %357 = arith.cmpi slt, %350, %c0_i32_117 : i32
    %358 = vector.broadcast %357 : i1 to vector<1x32xi1>
    %359 = vector.broadcast %358 : vector<1x32xi1> to vector<1x32xi1>
    %360 = arith.xori %356, %359 : vector<1x32xi1>
    %361 = arith.andi %360, %354 : vector<1x32xi1>
    %362 = vector.broadcast %350 : i32 to vector<1x32xi32>
    %363 = arith.addi %352, %362 : vector<1x32xi32>
    %364 = arith.select %361, %363, %352 : vector<1x32xi1>, vector<1x32xi32>
    %c0_i32_118 = arith.constant 0 : i32
    %365 = vector.broadcast %c0_i32_118 : i32 to vector<1x32xi32>
    %366 = arith.cmpi eq, %364, %365 : vector<1x32xi32>
    %367 = arith.andi %348, %366 : vector<1x32xi1>
    %368 = arith.extui %367 : vector<1x32xi1> to vector<1x32xi32>
    %369 = arith.sitofp %368 : vector<1x32xi32> to vector<1x32xf32>
    %370 = vector.shape_cast %369 : vector<1x32xf32> to vector<1x1x32xf32>
    %371 = vector.broadcast %370 : vector<1x1x32xf32> to vector<2x4x32xf32>
    %372 = arith.mulf %103, %371 : vector<2x4x32xf32>
    %cst_119 = arith.constant dense<0.000000e+00> : vector<2x4xf32>
    %373 = vector.multi_reduction <add>, %372, %cst_119 [2] : vector<2x4x32xf32> to vector<2x4xf32>
    %c0_120 = arith.constant 0 : index
    %c0_121 = arith.constant 0 : index
    %374 = vector.load %arg11[%c0_120, %c0_121] : memref<2x36xf32, #tpu.memory_space<vmem>>, vector<2x36xf32>
    %375 = tpu.concatenate %133, %163, %193, %223, %253, %283, %313, %343, %373 in 1 : vector<2x4xf32>, vector<2x4xf32>, vector<2x4xf32>, vector<2x4xf32>, vector<2x4xf32>, vector<2x4xf32>, vector<2x4xf32>, vector<2x4xf32>, vector<2x4xf32> -> vector<2x36xf32>
    %376 = arith.addf %374, %375 : vector<2x36xf32>
    %c0_122 = arith.constant 0 : index
    %c0_123 = arith.constant 0 : index
    %377 = vector.load %arg11[%c0_122, %c0_123] : memref<2x36xf32, #tpu.memory_space<vmem>>, vector<2x36xf32>
    tpu.vector_store %arg11[%c0_122, %c0_123], %376 {strides = array<i32>} : memref<2x36xf32, #tpu.memory_space<vmem>>, vector<2x36xf32>,
    %c1_i32_124 = arith.constant 1 : i32
    %378 = arith.cmpi eq, %arg0, %c1_i32_124 : i32
    %379 = arith.extui %378 : i1 to i32
    %c0_i32_125 = arith.constant 0 : i32
    %380 = arith.cmpi ne, %379, %c0_i32_125 : i32
    scf.if %380 {
      %c0_126 = arith.constant 0 : index
      %c0_127 = arith.constant 0 : index
      %381 = vector.load %arg11[%c0_126, %c0_127] : memref<2x36xf32, #tpu.memory_space<vmem>>, vector<2x36xf32>
      %cst_128 = arith.constant 3.906250e-03 : f32
      %382 = vector.broadcast %cst_128 : f32 to vector<2x36xf32>
      %383 = arith.mulf %381, %382 : vector<2x36xf32>
      %c0_129 = arith.constant 0 : index
      %c0_130 = arith.constant 0 : index
      %384 = vector.load %arg2[%c0_129, %c0_130] : memref<36x32xf32, #tpu.memory_space<vmem>>, vector<36x32xf32>
      %cst_131 = arith.constant dense<0.000000e+00> : vector<2x32xf32>
      %385 = tpu.matmul %383, %384, %cst_131 {dimension_numbers = #tpu.dot_dimension_numbers<[1], [0], [0], [1], [0, 0, 1, 1], [], []>} : vector<2x36xf32>, vector<36x32xf32>, vector<2x32xf32> -> vector<2x32xf32>
      %c0_132 = arith.constant 0 : index
      %c0_133 = arith.constant 0 : index
      %386 = vector.load %arg3[%c0_132, %c0_133] : memref<32x1280xf32, #tpu.memory_space<vmem>>, vector<32x1280xf32>
      %cst_134 = arith.constant dense<0.000000e+00> : vector<2x1280xf32>
      %387 = tpu.matmul %385, %386, %cst_134 {dimension_numbers = #tpu.dot_dimension_numbers<[1], [0], [0], [1], [0, 0, 1, 1], [], []>} : vector<2x32xf32>, vector<32x1280xf32>, vector<2x1280xf32> -> vector<2x1280xf32>
      %cst_135 = arith.constant 0.000000e+00 : f32
      %388 = vector.broadcast %cst_135 : f32 to vector<2x1280xf32>
      %389 = arith.maximumf %387, %388 : vector<2x1280xf32>
      %c0_136 = arith.constant 0 : index
      %c0_137 = arith.constant 0 : index
      %390 = vector.load %arg4[%c0_136, %c0_137] : memref<2x5xf32, #tpu.memory_space<vmem>>, vector<2x5xf32>
      %c0_138 = arith.constant 0 : index
      %391 = memref.load %arg9[%c0_138] : memref<3xf32, #tpu.memory_space<smem>>
      %c1 = arith.constant 1 : index
      %392 = memref.load %arg9[%c1] : memref<3xf32, #tpu.memory_space<smem>>
      %c2 = arith.constant 2 : index
      %393 = memref.load %arg9[%c2] : memref<3xf32, #tpu.memory_space<smem>>
      %c0_139 = arith.constant 0 : index
      %c0_140 = arith.constant 0 : index
      %394 = vector.load %arg5[%c0_139, %c0_140] : memref<1x1280xf32, #tpu.memory_space<vmem>>, vector<1x1280xf32>
      %395 = vector.broadcast %394 : vector<1x1280xf32> to vector<2x1280xf32>
      %396 = arith.mulf %389, %395 : vector<2x1280xf32>
      %cst_141 = arith.constant dense<0.000000e+00> : vector<2xf32>
      %397 = vector.multi_reduction <add>, %396, %cst_141 [1] : vector<2x1280xf32> to vector<2xf32>
      %398 = vector.shape_cast %397 : vector<2xf32> to vector<2x1xf32>
      %c0_142 = arith.constant 0 : index
      %c0_143 = arith.constant 0 : index
      %399 = vector.load %arg6[%c0_142, %c0_143] : memref<1x5xf32, #tpu.memory_space<vmem>>, vector<1x5xf32>
      %400 = vector.broadcast %399 : vector<1x5xf32> to vector<2x5xf32>
      %401 = arith.mulf %390, %400 : vector<2x5xf32>
      %cst_144 = arith.constant dense<0.000000e+00> : vector<2xf32>
      %402 = vector.multi_reduction <add>, %401, %cst_144 [1] : vector<2x5xf32> to vector<2xf32>
      %403 = vector.shape_cast %402 : vector<2xf32> to vector<2x1xf32>
      %404 = arith.addf %398, %403 : vector<2x1xf32>
      %405 = vector.broadcast %391 : f32 to vector<2x1xf32>
      %406 = arith.addf %404, %405 : vector<2x1xf32>
      %c0_145 = arith.constant 0 : index
      %c0_146 = arith.constant 0 : index
      %407 = vector.load %arg7[%c0_145, %c0_146] : memref<1x1280xf32, #tpu.memory_space<vmem>>, vector<1x1280xf32>
      %408 = vector.broadcast %407 : vector<1x1280xf32> to vector<2x1280xf32>
      %409 = arith.mulf %389, %408 : vector<2x1280xf32>
      %cst_147 = arith.constant dense<0.000000e+00> : vector<2xf32>
      %410 = vector.multi_reduction <add>, %409, %cst_147 [1] : vector<2x1280xf32> to vector<2xf32>
      %411 = vector.shape_cast %410 : vector<2xf32> to vector<2x1xf32>
      %c0_148 = arith.constant 0 : index
      %c0_149 = arith.constant 0 : index
      %412 = vector.load %arg8[%c0_148, %c0_149] : memref<1x5xf32, #tpu.memory_space<vmem>>, vector<1x5xf32>
      %413 = vector.broadcast %412 : vector<1x5xf32> to vector<2x5xf32>
      %414 = arith.mulf %390, %413 : vector<2x5xf32>
      %cst_150 = arith.constant dense<0.000000e+00> : vector<2xf32>
      %415 = vector.multi_reduction <add>, %414, %cst_150 [1] : vector<2x5xf32> to vector<2xf32>
      %416 = vector.shape_cast %415 : vector<2xf32> to vector<2x1xf32>
      %417 = arith.addf %411, %416 : vector<2x1xf32>
      %418 = vector.broadcast %393 : f32 to vector<2x1xf32>
      %419 = arith.mulf %406, %418 : vector<2x1xf32>
      %420 = arith.addf %417, %419 : vector<2x1xf32>
      %421 = vector.broadcast %392 : f32 to vector<2x1xf32>
      %422 = arith.addf %420, %421 : vector<2x1xf32>
      %423 = tpu.concatenate %406, %422 in 1 : vector<2x1xf32>, vector<2x1xf32> -> vector<2x2xf32>
      %c0_151 = arith.constant 0 : index
      %c0_152 = arith.constant 0 : index
      %424 = vector.load %arg10[%c0_151, %c0_152] : memref<2x2xf32, #tpu.memory_space<vmem>>, vector<2x2xf32>
      tpu.vector_store %arg10[%c0_151, %c0_152], %423 {strides = array<i32>} : memref<2x2xf32, #tpu.memory_space<vmem>>, vector<2x2xf32>,
    } else {
    }
    return
  }
  func.func @transform_0(%arg0: i32) -> (i32, i32, i32, i32) {
    %c0_i32 = arith.constant 0 : i32
    %c0_i32_0 = arith.constant 0 : i32
    %c0_i32_1 = arith.constant 0 : i32
    %c0_i32_2 = arith.constant 0 : i32
    return %c0_i32, %c0_i32_0, %arg0, %c0_i32_1 : i32, i32, i32, i32
  }
  func.func @transform_1(%arg0: i32) -> (i32, i32) {
    %c0_i32 = arith.constant 0 : i32
    %c0_i32_0 = arith.constant 0 : i32
    %c0_i32_1 = arith.constant 0 : i32
    return %c0_i32, %c0_i32_0 : i32, i32
  }
  func.func @transform_2(%arg0: i32) -> (i32, i32) {
    %c0_i32 = arith.constant 0 : i32
    %c0_i32_0 = arith.constant 0 : i32
    %c0_i32_1 = arith.constant 0 : i32
    return %c0_i32, %c0_i32_0 : i32, i32
  }
  func.func @transform_3(%arg0: i32) -> (i32, i32) {
    %c0_i32 = arith.constant 0 : i32
    %c0_i32_0 = arith.constant 0 : i32
    %c0_i32_1 = arith.constant 0 : i32
    return %c0_i32, %c0_i32_0 : i32, i32
  }
  func.func @transform_4(%arg0: i32) -> (i32, i32) {
    %c0_i32 = arith.constant 0 : i32
    %c0_i32_0 = arith.constant 0 : i32
    %c0_i32_1 = arith.constant 0 : i32
    return %c0_i32, %c0_i32_0 : i32, i32
  }
  func.func @transform_5(%arg0: i32) -> (i32, i32) {
    %c0_i32 = arith.constant 0 : i32
    %c0_i32_0 = arith.constant 0 : i32
    %c0_i32_1 = arith.constant 0 : i32
    return %c0_i32, %c0_i32_0 : i32, i32
  }
  func.func @transform_6(%arg0: i32) -> (i32, i32) {
    %c0_i32 = arith.constant 0 : i32
    %c0_i32_0 = arith.constant 0 : i32
    %c0_i32_1 = arith.constant 0 : i32
    return %c0_i32, %c0_i32_0 : i32, i32
  }
  func.func @transform_7(%arg0: i32) -> (i32, i32) {
    %c0_i32 = arith.constant 0 : i32
    %c0_i32_0 = arith.constant 0 : i32
    %c0_i32_1 = arith.constant 0 : i32
    return %c0_i32, %c0_i32_0 : i32, i32
  }
  func.func @transform_8(%arg0: i32) -> i32 {
    %c0_i32 = arith.constant 0 : i32
    %c0_i32_0 = arith.constant 0 : i32
    return %c0_i32 : i32
  }
  func.func @transform_9(%arg0: i32) -> (i32, i32) {
    %c0_i32 = arith.constant 0 : i32
    %c0_i32_0 = arith.constant 0 : i32
    %c0_i32_1 = arith.constant 0 : i32
    return %c0_i32, %c0_i32_0 : i32, i32
  }
}

</mosaic_0001>

<bundles_post_ra>
// kernel: tpu_custom_call.1
= control target key start
LH: loop header
LB: loop body
LE: loop exit
PB: predicated region body
PF: predicated region fallthrough
CT: control target
= control target key end

     0   :  { %14 = vsyncpa [#allocation4], 0  ;;  %s2772_s0 = inlined_call_operand.hbm [shape: bf16[2,4,32,32], index: 0, kind: input, shape index: {}]   ;;  %s2773_s1 = inlined_call_operand.vmem [shape: f32[36,32], index: 1, kind: input, shape index: {}]   ;;  %s2774_s2 = inlined_call_operand.hbm [shape: f32[32,1280], index: 2, kind: input, shape index: {}]   ;;  %s2775_s3 = inlined_call_operand.vmem [shape: f32[2,5], index: 3, kind: input, shape index: {}]   ;;  %s2776_s4 = inlined_call_operand.vmem [shape: f32[1,1280], index: 4, kind: input, shape index: {}]   ;;  %s2777_s5 = inlined_call_operand.vmem [shape: f32[1,5], index: 5, kind: input, shape index: {}]   ;;  %s2778_s6 = inlined_call_operand.vmem [shape: f32[1,1280], index: 6, kind: input, shape index: {}]   ;;  %s2779_s7 = inlined_call_operand.vmem [shape: f32[1,5], index: 7, kind: input, shape index: {}]   ;;  %s2780_s8 = inlined_call_operand.vmem [shape: f32[3], index: 8, kind: input, shape index: {}]   ;;  %s2781_s9 = inlined_call_operand.hbm [shape: f32[2,2], index: 9, kind: output, shape index: {}]  }
   0x1   :  { %16 = vsyncpa [#allocation4 + $0x1], 0 }
   0x2   :  { %17 = vsyncpa [#allocation8], 0 }
   0x3   :  { %18 = vsyncpa [#allocation6], 0 }
   0x4   :  { %19 = vsyncpa [#allocation5], 0  ;;  %s2085_s30 = smov 0   ;;  %s2087_s10 = smov 0  }
   0x5   :  { %s2089_s11 = smov 0   ;;  %s2091_s12 = smov 0  }
   0x6 LB: > { %s2104_s13 = sadd.s32 4294967295, %s2020_s12   ;;  %s2107_s14 = sadd.s32 1, %s2020_s12   ;;  %s2020_s12 = sphi %s2091_s12, %s2860_s12   ;;  %s2016_s11 = sphi %s2089_s11, %s2859_s11   ;;  %s2012_s10 = sphi %s2087_s10, %s2858_s10   ;;  %s2008_s30 = sphi %s2085_s30, %s2857_s30  }
   0x7   : > { %s29_s15 = ssub.s32 %s2020_s12, %s2107_s14  ;;  %s32_s16 = sadd.s32 1, %s2016_s11 }
   0x8   : > { %p30_p0 = scmp.eq.s32.totalorder %s29_s15, 0  ;;  %p39_p1 = scmp.ne.s32.totalorder %s2016_s11, %s2012_s10 }
   0x9   : > { %p40_p2 = scmp.eq.s32.totalorder %s2020_s12, 0  ;;  %p45_p3 = scmp.ne.s32.totalorder %s2012_s10, %s2008_s30 }
   0xa   : > { %s2117_s17 = scalar_select %p30_p0, %s2016_s11, %s32_s16  }
   0xb   : > { %p2119_p4 = por %p40_p2, %p39_p1  ;;  %p46_p5 = scmp.eq.s32.totalorder %s2104_s13, 0 }
   0xc   : > { %p1737_p6 = scmp.ge.s32.totalorder %s2020_s12, 1  ;;  %p245_p7 = scmp.lt.s32.totalorder %s2020_s12, 3 }
   0xd   : > { %p2128_p8 = por %p46_p5, %p45_p3  ;;  %p1738_p9 = scmp.ne.s32.totalorder %s2104_s13, 0 }
   0xe   : > { %p2133_p10 = pnand %p1737_p6, %p245_p7  ;;  %s259_s23 = sshll.u32 %s2774_s2, 4  ;;  %s260_s23 = int_to_ptr.hbm [resolvable:$true] %s259_s23 }
   0xf   : > { %s2022_s24 = smov [#allocation7]   ;;  %s289_s28 = sshll.u32 %s2780_s8, 4  ;;  %s290_s28 = int_to_ptr.vmem [resolvable:$true] %s289_s28 }
  0x10   : > { %p1841_p11 = pneg %p2133_p10  ;;  %s261_s25 = sshll.u32 %s2022_s24, 4  ;;  %s262_s25 = int_to_ptr.vmem [resolvable:$true] %s261_s25 }
  0x11   : > { %s2023_s29 = smov 1280   ;;  %s2024_s30 = smov 80  }
  0x12   : > { %p1842_p12 = pnand %p1841_p11, %p46_p5  ;;  %s2025_s15 = smov [#allocation9]  }
  0x13   : > { %p1740_p13 = scmp.ge.s32.totalorder %s2020_s12, 2 }
  0x14   : > { %1844 = dma.hbm_to_vmem [thread:$0]  (!%p1842_p12), %s260_s23, 5120, %s262_s25, [#allocation8], %s2023_s29, %s2023_s29, %s2024_s30  }
  0x15   : > { %1847 = dma.vmem_to_smem (!%p1842_p12), %s290_s28, 16, %s2025_s15, [#allocation6]  }
  0x16   : > { %296 = sbr.rel (%p1740_p13) target bundleno = 41 (0x29), region = 48 }
  0x1b   : > { %s300_s16 = sand.u32 1, %s2016_s11   ;;  %s1780_s21 = sshll.u32 %s2020_s12, 3 }
  0x1c   : > { %s1741_s22 = sshll.u32 %s300_s16, 6  ;;  %s309_s27 = scalar_lea.hbm %s2772_s0, %s1780_s21 }
  0x1d   : > { %s1824_s23 = scalar_select %p2119_p4, [#allocation0], [#allocation13] }
  0x1e   : > { %s322_s25 = sshll.u32 %s309_s27, 4  ;;  %s304_s28 = scalar_lea.vmem [#allocation3], %s1741_s22  ;;  %s323_s25 = int_to_ptr.hbm [resolvable:$true] %s322_s25 }
  0x1f   : > { %s324_s29 = sshll.u32 %s304_s28, 4  ;;  %s314_s30 = sld [smem:[%s1824_s23]]   ;;  %s325_s29 = int_to_ptr.vmem [resolvable:$true] %s324_s29 }
  0x20   : > { %s2026_s15 = smov 256   ;;  %s2027_s12 = smov 128  }
  0x21   : > { %1825 = sst [smem:[#allocation12]] (%p2119_p4), %s2026_s15  ;;  %s2028_s24 = smov 2  }
  0x22   : > { %1826 = sst [smem:[#allocation12 + $0x1]] (%p2119_p4), %s2027_s12  ;;  %s2029_s21 = smov 64  }
  0x23   : > { %1827 = sst [smem:[#allocation12 + $0x2]] (%p2119_p4), %s2028_s24  ;;  %s2030_s27 = smov 4  }
  0x24   : > { %1828 = sst [smem:[#allocation12 + $0x3]] (%p2119_p4), %s2029_s21  ;;  %s301_s23 = scalar_lea.sflag [#allocation4], %s300_s16 }
  0x25   : > { %s1744_s26 = sshll.u32 %s314_s30, 26  ;;  %1829 = sst [smem:[#allocation12 + $0x4]] (%p2119_p4), %s2029_s21 }
  0x26   : > { %s1745_s22 = sadd.s32 134217728, %s1744_s26  ;;  %1830 = sst [smem:[#allocation12 + $0x5]] (%p2119_p4), %s2030_s27 }
  0x27   : > { %s2031_s28 = smov [#allocation11]  }
  0x28   : > { %1831 = dma.general (%p2119_p4), %s323_s25, 1024, %s325_s29, %s301_s23, %s2031_s28, [#allocation12], %s1745_s22, 0  }
  0x29 PF: > { %349 = sbr.rel (%p2133_p10) target bundleno = 772 (0x304), region = 56  ;;  %s351_s15 = sand.u32 (!%p2133_p10), 1, %s2012_s10  }
  0x2a   : > { %s1747_s12 = sshll.u32 (!%p2133_p10), %s351_s15, 6  ;;  %s352_s24 = scalar_lea.sflag (!%p2133_p10), [#allocation4], %s351_s15 }
  0x2b   : > { %s2172_s30 = scalar_lea.vmem (!%p2133_p10), [#allocation3], %s1747_s12 }
  0x2e   : > { %1991 = dma.done.wait (%p2128_p8), %s352_s24, 1024  }
  0x2f   : > { %1993 = vsyncadd (%p2128_p8), %s352_s24, 4294966272 }
  0x30   : > { %1995 = dma.done.wait (%p46_p5), [#allocation8], 5120  }
  0x31   : > { %1997 = vsyncadd (%p46_p5), [#allocation8], 4294962176 }
  0x32   : > { %1999 = dma.done.wait (%p46_p5), [#allocation6], 16  }
  0x33   : > { %2001 = vsyncadd (%p46_p5), [#allocation6], 4294967280 }
  0x34   : > { %371 = sfence }
  0x35   : > { %401 = sbr.rel (%p1738_p9) target bundleno = 60 (0x3c), region = 72 }
  0x3a   : > { %vm402_vm0 = vcmask 287744   ;;  %v2032_v0 = vmov 0.0  }
  0x3b   : > { %403 = vst.msk [vmem:[#allocation2] sm:$0x3] %vm402_vm0, %v2032_v0 }
  0x3c PF: > { %v436_v1 = vlaneseq  ;;  %s1751_s18 = sshll.u32 %s2104_s13, 4  ;;  %v1782_v14 = vld [vmem:[%s2172_s30] sm:$0xff]   ;;  %v1813_v17 = vld [vmem:[%s2172_s30 + $0x8] sm:$0xff]   ;;  %v1814_v21 = vld [vmem:[%s2172_s30 + $0x10] sm:$0xff]   ;;  %v2033_v57 = vmov 0.0   ;;  %p1761_p0 = scmp.ne.s32.totalorder %s2104_s13, 1 }
  0x3d   : > { %v440_v3 = vstv %s1751_s18  ;;  %v1815_v22 = vld [vmem:[%s2172_s30 + $0x18] sm:$0xff]   ;;  %v2231_v25 = vunpack.c.l.bf16 %v1782_v14  ;;  %v2244_v29 = vunpack.c.h.bf16 %v1782_v14  ;;  %v2246_v30 = vunpack.c.l.bf16 %v1813_v17  ;;  %v1816_v38 = vld [vmem:[%s2172_s30 + $0x20] sm:$0xff]   ;;  %v1817_v39 = vld [vmem:[%s2172_s30 + $0x28] sm:$0xff]   ;;  %s1511_s27 = sld [smem:[#allocation9]] (!%p1761_p0) }
  0x3e   : > { %v437_v2 = vshrl.u32 %v436_v1, 7  ;;  %v2189_v4 = vand.u32 127, %v436_v1  ;;  %v2248_v31 = vunpack.c.h.bf16 %v1813_v17  ;;  %v2258_v34 = vunpack.c.l.bf16 %v1814_v21  ;;  %v1818_v43 = vld [vmem:[%s2172_s30 + $0x30] sm:$0xff]   ;;  %v1819_v46 = vld [vmem:[%s2172_s30 + $0x38] sm:$0xff]   ;;  %s1775_s23 = sld [smem:[#allocation9 + $0x2]] (!%p1761_p0) }
  0x3f   : > { %v2260_v35 = vunpack.c.h.bf16 %v1814_v21  ;;  %v2262_v36 = vunpack.c.l.bf16 %v1815_v22  ;;  %v2282_v44 = vunpack.c.h.bf16 %v1815_v22  ;;  %v2287_v48 = vunpack.c.l.bf16 %v1816_v38  ;;  %s1774_s28 = sld [smem:[#allocation9 + $0x1]] (!%p1761_p0) }
  0x40   : > { %v438_v5 = vadd.s32 8, %v437_v2  ;;  %v441_v6 = vadd.s32 %v440_v3, %v437_v2  ;;  %v447_v7 = vadd.s32 1, %v2189_v4  ;;  %v2289_v49 = vunpack.c.h.bf16 %v1816_v38 }
  0x41   : > { %v2291_v50 = vunpack.c.l.bf16 %v1817_v39  ;;  %v2296_v52 = vunpack.c.h.bf16 %v1817_v39  ;;  %v2298_v53 = vunpack.c.l.bf16 %v1818_v43  ;;  %v2305_v54 = vunpack.c.h.bf16 %v1818_v43 }
  0x42   : > { %v442_v8 = vadd.s32 %v440_v3, %v438_v5  ;;  %v2192_v9 = vadd.s32 1, %v441_v6  ;;  %v784_v10 = vand.u32 1, %v447_v7  ;;  %vm879_vm2 = vcmp.ge.s32.totalorder %v447_v7, 2 }
  0x43   : > { %vm880_vm3 = vcmp.lt.s32.totalorder %v447_v7, 34  ;;  %vm778_vm7 = vcmp.lt.s32.totalorder %v447_v7, 32  ;;  %vm837_vm15 = vcmp.lt.s32.totalorder %v447_v7, 33  ;;  %v2307_v55 = vunpack.c.l.bf16 %v1819_v46 }
  0x44   : > { %v2194_v11 = vadd.s32 1, %v442_v8  ;;  %vm454_vm1 = vcmp.lt.s32.totalorder %v2192_v9, 0  ;;  %v455_v12 = vsub.s32 0, %v2192_v9  ;;  %vm448_vm4 = vcmp.ge.s32.totalorder %v2192_v9, 0  ;;  %vm2217_vm11 = vmand %vm879_vm2, %vm880_vm3 }
  0x45   : > { %vm450_vm5 = vcmp.lt.s32.totalorder %v2192_v9, 32  ;;  %vm2206_vm8 = vcmp.eq.s32.totalorder %v784_v10, 0  ;;  %vm2240_vm0 = vcmp.eq.s32.totalorder %v784_v10, 1  ;;  %v2309_v56 = vunpack.c.h.bf16 %v1819_v46 }
  0x46   : > { %vm461_vm6 = vcmp.lt.s32.totalorder %v2194_v11, 0  ;;  %v462_v13 = vsub.s32 0, %v2194_v11  ;;  %v456_v15 = vsel %vm454_vm1, %v455_v12, %v2192_v9  ;;  %vm449_vm9 = vcmp.ge.s32.totalorder %v2194_v11, 0  ;;  %vm2227_vm12 = vmand %vm448_vm4, %vm450_vm5 }
  0x47   : > { %vm451_vm10 = vcmp.lt.s32.totalorder %v2194_v11, 32  ;;  %v458_v18 = vand.u32 1, %v456_v15  ;;  %vm2236_vm14 = vmand %vm778_vm7, %vm2206_vm8 }
  0x48   : > { %v463_v19 = vsel %vm461_vm6, %v462_v13, %v2194_v11  ;;  %vm2254_vm2 = vmand %vm449_vm9, %vm451_vm10  ;;  %v2319_v59 = vsel %vm2236_vm14, 1.0, %v2033_v57 }
  0x49   : > { %v465_v24 = vand.u32 1, %v463_v19  ;;  %v459_v26 = vsub.s32 0, %v458_v18  ;;  %vm882_vm3 = vmand %vm2217_vm11, %vm2206_vm8  ;;  %vm2799_vm8 = vcmask 261120  }
  0x4a   : > { %vm2277_vm7 = vmand %vm837_vm15, %vm2240_vm0  ;;  %v2332_v61 = vsel %vm882_vm3, 1.0, %v2033_v57 }
  0x4b   : > { %v466_v33 = vsub.s32 0, %v465_v24  ;;  %v460_v37 = vsel %vm454_vm1, %v459_v26, %v458_v18  ;;  %v2324_v60 = vsel %vm2277_vm7, 1.0, %v2033_v57  ;;  %vm2800_vm11 = vmmov %vm2799_vm8 }
  0x4c   : > { %vm468_vm4 = vcmp.ne.s32.totalorder %v460_v37, 0  ;;  %vm470_vm5 = vcmp.lt.s32.totalorder %v460_v37, 0  ;;  %v474_v41 = vadd.s32 2, %v460_v37  ;;  %vm2802_vm14 = vmmov %vm2799_vm8 }
  0x4d   : > { %v467_v40 = vsel %vm461_vm6, %v466_v33, %v465_v24  ;;  %vm472_vm10 = vmand %vm470_vm5, %vm468_vm4 }
  0x4e   : > { %vm469_vm1 = vcmp.ne.s32.totalorder %v467_v40, 0  ;;  %vm471_vm9 = vcmp.lt.s32.totalorder %v467_v40, 0  ;;  %v475_v45 = vadd.s32 2, %v467_v40  ;;  %v2285_v47 = vsel %vm472_vm10, %v474_v41, %v460_v37 }
  0x4f   : > { %vm473_vm13 = vmand %vm471_vm9, %vm469_vm1  ;;  %vm478_vm6 = vcmp.eq.s32.totalorder %v2285_v47, 0  ;;  %vm575_vm10 = vcmp.ge.s32.totalorder %v2192_v9, 1 }
  0x50   : > { %v2293_v51 = vsel %vm473_vm13, %v475_v45, %v467_v40  ;;  %vm480_vm0 = vmand %vm2227_vm12, %vm478_vm6 }
  0x51   : > { %vm479_vm15 = vcmp.eq.s32.totalorder %v2293_v51, 0  ;;  %v1752_v58 = vsel %vm480_vm0, 1.0, %v2033_v57  ;;  %vm2801_vm12 = vmmov %vm2799_vm8  ;;  %vm577_vm0 = vcmp.lt.s32.totalorder %v2192_v9, 33 }
  0x52   : > { %vm481_vm13 = vmand %vm2254_vm2, %vm479_vm15  ;;  %v486_v63 = vmul.f32 %v2231_v25, %v1752_v58  ;;  %v488_v0 = vmul.f32 %v2246_v30, %v1752_v58  ;;  %v490_v1 = vmul.f32 %v2258_v34, %v1752_v58  ;;  %v492_v6 = vmul.f32 %v2262_v36, %v1752_v58 }
  0x53   : > { %v1753_v62 = vsel %vm481_vm13, 1.0, %v2033_v57  ;;  %vm2803_vm2 = vmmov %vm2799_vm8  ;;  %v494_v22 = vmul.f32 %v2287_v48, %v1752_v58  ;;  %v496_v24 = vmul.f32 %v2291_v50, %v1752_v58  ;;  %v498_v37 = vmul.f32 %v2298_v53, %v1752_v58 }
  0x54   : > { %v487_v2 = vmul.f32 %v2244_v29, %v1753_v62  ;;  %v489_v3 = vmul.f32 %v2248_v31, %v1753_v62  ;;  %v491_v5 = vmul.f32 %v2260_v35, %v1753_v62  ;;  %v493_v7 = vmul.f32 %v2282_v44, %v1753_v62  ;;  %vm2804_vm3 = vmmov %vm2803_vm2 }
  0x55   : > { %v503_v8 = vsel %vm2799_vm8, %v486_v63, 0.0  ;;  %v512_v10 = vsel %vm2800_vm11, %v488_v0, 0.0  ;;  %v521_v12 = vsel %vm2801_vm12, %v490_v1, 0.0  ;;  %vm2805_vm4 = vmmov %vm2803_vm2  ;;  %v495_v23 = vmul.f32 %v2289_v49, %v1753_v62 }
  0x56   : > { %v504_v13 = vsel %vm2802_vm14, %v487_v2, 0.0  ;;  %v513_v14 = vsel %vm2803_vm2, %v489_v3, 0.0  ;;  %v522_v15 = vsel %vm2804_vm3, %v491_v5, 0.0  ;;  %v530_v16 = vsel %vm2805_vm4, %v492_v6, 0.0  ;;  %vm2806_vm5 = vmmov %vm2803_vm2 }
  0x57   : > { %v505_v17 = vadd.f32 %v504_v13, %v503_v8  ;;  %v514_v18 = vadd.f32 %v513_v14, %v512_v10  ;;  %v523_v19 = vadd.f32 %v522_v15, %v521_v12  ;;  %v531_v20 = vsel %vm2806_vm5, %v493_v7, 0.0  ;;  %vm2807_vm7 = vmmov %vm2803_vm2 }
  0x58   : > { %v532_v21 = vadd.f32 %v531_v20, %v530_v16  ;;  %v497_v32 = vmul.f32 %v2296_v52, %v1753_v62  ;;  %v499_v38 = vmul.f32 %v2305_v54, %v1753_v62  ;;  %v500_v39 = vmul.f32 %v2307_v55, %v1752_v58  ;;  %vm2808_vm1 = vmmov %vm2803_vm2 }
  0x59   : > { %v506_v26 = vrot.slane %v505_v17, 4  ;;  %v515_v27 = vrot.slane %v514_v18, 4  ;;  %v524_v28 = vrot.slane %v523_v19, 4  ;;  %v501_v43 = vmul.f32 %v2309_v56, %v1753_v62  ;;  %vm2809_vm9 = vmmov %vm2808_vm1 }
  0x5a   : > { %v533_v33 = vrot.slane %v532_v21, 4  ;;  %v539_v46 = vsel %vm2807_vm7, %v494_v22, 0.0  ;;  %v540_v63 = vsel %vm2808_vm1, %v495_v23, 0.0  ;;  %v548_v0 = vsel %vm2809_vm9, %v496_v24, 0.0  ;;  %vm2810_vm8 = vmmov %vm2808_vm1 }
  0x5b   : > { %v507_v40 = vadd.f32 %v506_v26, %v505_v17  ;;  %v516_v41 = vadd.f32 %v515_v27, %v514_v18  ;;  %v525_v42 = vadd.f32 %v524_v28, %v523_v19  ;;  %v541_v5 = vadd.f32 %v540_v63, %v539_v46  ;;  %vm2811_vm11 = vmmov %vm2808_vm1 }
  0x5c   : > { %v534_v45 = vadd.f32 %v533_v33, %v532_v21  ;;  %vm813_vm13 = vcmask 1041409   ;;  %v549_v6 = vsel %vm2810_vm8, %v497_v32, 0.0  ;;  %v557_v62 = vsel %vm2811_vm11, %v498_v37, 0.0  ;;  %vm2812_vm12 = vmmov %vm2808_vm1 }
  0x5d   : > { %v508_v1 = vrot.slane %v507_v40, 2  ;;  %v517_v2 = vrot.slane %v516_v41, 2  ;;  %v526_v3 = vrot.slane %v525_v42, 2  ;;  %v558_v7 = vsel %vm2812_vm12, %v499_v38, 0.0  ;;  %vm2813_vm5 = vmmov %vm2808_vm1 }
  0x5e   : > { %v535_v58 = vrot.slane %v534_v45, 2  ;;  %vm576_vm14 = vcmp.ge.s32.totalorder %v2194_v11, 1  ;;  %vm578_vm2 = vcmp.lt.s32.totalorder %v2194_v11, 33  ;;  %vm816_vm3 = vcmask 1042434   ;;  %vm2814_vm8 = vmmov %vm2813_vm5 }
  0x5f   : > { %v509_v8 = vadd.f32 %v508_v1, %v507_v40  ;;  %v518_v10 = vadd.f32 %v517_v2, %v516_v41  ;;  %v527_v12 = vadd.f32 %v526_v3, %v525_v42  ;;  %v542_v13 = vrot.slane %v541_v5, 4  ;;  %vm579_vm11 = vmand %vm575_vm10, %vm577_vm0 }
  0x60   : > { %v536_v14 = vadd.f32 %v535_v58, %v534_v45  ;;  %vm819_vm4 = vcmask 1043459   ;;  %v550_v15 = vadd.f32 %v549_v6, %v548_v0  ;;  %v559_v16 = vadd.f32 %v558_v7, %v557_v62  ;;  %vm580_vm12 = vmand %vm576_vm14, %vm578_vm2 }
  0x61   : > { %v566_v17 = vsel %vm2813_vm5, %v500_v39, 0.0  ;;  %vm581_vm7 = vcmp.eq.s32.totalorder %v2285_v47, 1  ;;  %v510_v18 = vrot.slane %v509_v8, 1  ;;  %v519_v19 = vrot.slane %v518_v10, 1  ;;  %vm2815_vm14 = vmmov %vm2813_vm5 }
  0x62   : > { %v528_v20 = vrot.slane %v527_v12, 1  ;;  %vm829_vm1 = vcmask 257024   ;;  %v543_v21 = vadd.f32 %v542_v13, %v541_v5  ;;  %vm582_vm9 = vcmp.eq.s32.totalorder %v2293_v51, 1  ;;  %vm583_vm10 = vmand %vm579_vm11, %vm581_vm7 }
  0x63   : > { %v537_v22 = vrot.slane %v536_v14, 1  ;;  %v551_v23 = vrot.slane %v550_v15, 4  ;;  %v560_v24 = vrot.slane %v559_v16, 4  ;;  %v567_v26 = vsel %vm2814_vm8, %v501_v43, 0.0  ;;  %vm584_vm0 = vmand %vm580_vm12, %vm582_vm9 }
  0x64   : > { %v511_v27 = vadd.f32 %v510_v18, %v509_v8  ;;  %v520_v28 = vadd.f32 %v519_v19, %v518_v10  ;;  %v529_v32 = vadd.f32 %v528_v20, %v527_v12  ;;  %v544_v33 = vrot.slane %v543_v21, 2  ;;  %vm2816_vm2 = vmmov %vm2813_vm5 }
  0x65   : > { %v538_v37 = vadd.f32 %v537_v22, %v536_v14  ;;  %v552_v38 = vadd.f32 %v551_v23, %v550_v15  ;;  %v561_v39 = vadd.f32 %v560_v24, %v559_v16  ;;  %v568_v40 = vadd.f32 %v567_v26, %v566_v17  ;;  %vm2817_vm5 = vmmov %vm2816_vm2 }
  0x66   : > { %v885_v41 = vmul.f32 %v2332_v61, %v511_v27  ;;  %v886_v42 = vmul.f32 %v2332_v61, %v520_v28  ;;  %v887_v45 = vmul.f32 %v2332_v61, %v529_v32  ;;  %v843_v46 = vmul.f32 %v2324_v60, %v511_v27  ;;  %vm2818_vm7 = vmmov %vm2816_vm2 }
  0x67   : > { %v888_v63 = vmul.f32 %v2332_v61, %v538_v37  ;;  %v844_v43 = vmul.f32 %v2324_v60, %v520_v28  ;;  %v845_v0 = vmul.f32 %v2324_v60, %v529_v32  ;;  %v846_v1 = vmul.f32 %v2324_v60, %v538_v37  ;;  %vm2819_vm9 = vmmov %vm2816_vm2 }
  0x68   : > { %v901_v2 = vrot.slane %v886_v42, 7  ;;  %v903_v3 = vrot.slane %v887_v45, 6  ;;  %v796_v5 = vmul.f32 %v2319_v59, %v511_v27  ;;  %v797_v58 = vmul.f32 %v2319_v59, %v520_v28  ;;  %vm2820_vm8 = vmmov %vm2816_vm2 }
  0x69   : > { %v905_v6 = vrot.slane %v888_v63, 5  ;;  %v859_v62 = vrot.slane %v844_v43, 7  ;;  %v861_v7 = vrot.slane %v845_v0, 6  ;;  %v863_v8 = vrot.slane %v846_v1, 5  ;;  %vm2821_vm11 = vmmov %vm2816_vm2 }
  0x6a   : > { %v902_v10 = vsel %vm813_vm13, %v901_v2, %v885_v41  ;;  %v798_v12 = vmul.f32 %v2319_v59, %v529_v32  ;;  %v799_v13 = vmul.f32 %v2319_v59, %v538_v37  ;;  %v812_v14 = vrot.slane %v797_v58, 7  ;;  %vm2822_vm12 = vmmov %vm2816_vm2 }
  0x6b   : > { %v904_v15 = vsel %vm816_vm3, %v903_v3, %v902_v10  ;;  %v860_v16 = vsel %vm813_vm13, %v859_v62, %v843_v46  ;;  %v545_v17 = vadd.f32 %v544_v33, %v543_v21  ;;  %v553_v18 = vrot.slane %v552_v38, 2 }
  0x6c   : > { %v906_v19 = vsel %vm819_vm4, %v905_v6, %v904_v15  ;;  %v862_v20 = vsel %vm816_vm3, %v861_v7, %v860_v16  ;;  %v814_v22 = vsel %vm813_vm13, %v812_v14, %v796_v5  ;;  %v815_v23 = vrot.slane %v798_v12, 6 }
  0x6d   : > { %v915_v24 = vsel %vm829_vm1, %v906_v19, 0.0  ;;  %v864_v26 = vsel %vm819_vm4, %v863_v8, %v862_v20  ;;  %v818_v27 = vrot.slane %v799_v13, 5  ;;  %v546_v28 = vrot.slane %v545_v17, 1 }
  0x6e   : > { %916 = vadd.xlane.f32.xlu2 %v915_v24  ;;  %v873_v21 = vsel %vm829_vm1, %v864_v26, 0.0  ;;  %v817_v32 = vsel %vm816_vm3, %v815_v23, %v814_v22  ;;  %v554_v33 = vadd.f32 %v553_v18, %v552_v38  ;;  %v562_v37 = vrot.slane %v561_v39, 2 }
  0x6f   : > { %874 = vadd.xlane.f32.xlu1 %v873_v21  ;;  %v820_v41 = vsel %vm819_vm4, %v818_v27, %v817_v32  ;;  %v547_v42 = vadd.f32 %v546_v28, %v545_v17  ;;  %v569_v45 = vrot.slane %v568_v40, 4  ;;  %v2409_v46 = vsel %vm583_vm10, 1.0, %v2033_v57  ;;  %vm2823_vm10 = vmmov %vm2816_vm2 }
  0x70   : > { %v830_v63 = vsel %vm829_vm1, %v820_v41, 0.0  ;;  %v555_v43 = vrot.slane %v554_v33, 1  ;;  %v563_v0 = vadd.f32 %v562_v37, %v561_v39  ;;  %v2413_v1 = vsel %vm584_vm0, 1.0, %v2033_v57  ;;  %vm2824_vm0 = vmmov %vm2816_vm2 }
  0x71   : > { %831 = vadd.xlane.f32.xlu0 %v830_v63  ;;  %v570_v2 = vadd.f32 %v569_v45, %v568_v40  ;;  %v889_v38 = vmul.f32 %v2332_v61, %v547_v42  ;;  %v847_v3 = vmul.f32 %v2324_v60, %v547_v42  ;;  %v800_v5 = vmul.f32 %v2319_v59, %v547_v42 }
  0x72   : > { %v556_v58 = vadd.f32 %v555_v43, %v554_v33  ;;  %v564_v6 = vrot.slane %v563_v0, 1  ;;  %v597_v62 = vmul.f32 %v2287_v48, %v2409_v46  ;;  %v598_v7 = vmul.f32 %v2289_v49, %v2413_v1 }
  0x73   : > { %v571_v39 = vrot.slane %v570_v2, 2  ;;  %v599_v8 = vmul.f32 %v2291_v50, %v2409_v46  ;;  %v600_v40 = vmul.f32 %v2296_v52, %v2413_v1  ;;  %v601_v10 = vmul.f32 %v2298_v53, %v2409_v46 }
  0x74   : > { %v565_v12 = vadd.f32 %v564_v6, %v563_v0  ;;  %v890_v13 = vmul.f32 %v2332_v61, %v556_v58  ;;  %v848_v14 = vmul.f32 %v2324_v60, %v556_v58  ;;  %v801_v15 = vmul.f32 %v2319_v59, %v556_v58 }
  0x75   : > { %v572_v16 = vadd.f32 %v571_v39, %v570_v2  ;;  %v602_v17 = vmul.f32 %v2305_v54, %v2413_v1  ;;  %v603_v18 = vmul.f32 %v2307_v55, %v2409_v46  ;;  %v604_v19 = vmul.f32 %v2309_v56, %v2413_v1 }
  0x76   : > { %v891_v20 = vmul.f32 %v2332_v61, %v565_v12  ;;  %v907_v22 = vrot.slane %v890_v13, 7  ;;  %v849_v23 = vmul.f32 %v2324_v60, %v565_v12  ;;  %v865_v24 = vrot.slane %v848_v14, 7 }
  0x77   : > { %v573_v26 = vrot.slane %v572_v16, 1  ;;  %v802_v27 = vmul.f32 %v2319_v59, %v565_v12  ;;  %v821_v28 = vrot.slane %v801_v15, 7  ;;  %v641_v21 = vsel %vm2815_vm14, %v597_v62, 0.0  ;;  %vm2825_vm14 = vmmov %vm2824_vm0 }
  0x78   : > { %v908_v32 = vsel %vm813_vm13, %v907_v22, %v889_v38  ;;  %v909_v33 = vrot.slane %v891_v20, 6  ;;  %v866_v37 = vsel %vm813_vm13, %v865_v24, %v847_v3  ;;  %v867_v41 = vrot.slane %v849_v23, 6 }
  0x79   : > { %v574_v42 = vadd.f32 %v573_v26, %v572_v16  ;;  %v822_v45 = vsel %vm813_vm13, %v821_v28, %v800_v5  ;;  %v823_v63 = vrot.slane %v802_v27, 6  ;;  %v642_v43 = vsel %vm2816_vm2, %v598_v7, 0.0  ;;  %vm2826_vm2 = vmmov %vm2824_vm0 }
  0x7a   : > { %v910_v0 = vsel %vm816_vm3, %v909_v33, %v908_v32  ;;  %v868_v2 = vsel %vm816_vm3, %v867_v41, %v866_v37  ;;  %v643_v58 = vadd.f32 %v642_v43, %v641_v21  ;;  %v650_v6 = vsel %vm2817_vm5, %v599_v8, 0.0  ;;  %vm2827_vm5 = vmmov %vm2824_vm0 }
  0x7b   : > { %v892_v62 = vmul.f32 %v2332_v61, %v574_v42  ;;  %v850_v38 = vmul.f32 %v2324_v60, %v574_v42  ;;  %v803_v3 = vmul.f32 %v2319_v59, %v574_v42  ;;  %v824_v39 = vsel %vm816_vm3, %v823_v63, %v822_v45 }
  0x7c   : > { %v644_v12 = vrot.slane %v643_v58, 4  ;;  %v651_v5 = vsel %vm2818_vm7, %v600_v40, 0.0  ;;  %v659_v7 = vsel %vm2819_vm9, %v601_v10, 0.0  ;;  %v660_v13 = vsel %vm2820_vm8, %v602_v17, 0.0  ;;  %vm2828_vm7 = vmmov %vm2824_vm0 }
  0x7d   : > { %v911_v14 = vrot.slane %v892_v62, 5  ;;  %v869_v15 = vrot.slane %v850_v38, 5  ;;  %v825_v16 = vrot.slane %v803_v3, 5  ;;  %v652_v20 = vadd.f32 %v651_v5, %v650_v6  ;;  %vm2829_vm9 = vmmov %vm2824_vm0 }
  0x7e   : > { %v645_v8 = vadd.f32 %v644_v12, %v643_v58  ;;  %v661_v22 = vadd.f32 %v660_v13, %v659_v7  ;;  %v668_v23 = vsel %vm2821_vm11, %v603_v18, 0.0  ;;  %v669_v24 = vsel %vm2822_vm12, %v604_v19, 0.0  ;;  %vm2830_vm8 = vmmov %vm2824_vm0 }
  0x7f   : > { %v912_v26 = vsel %vm819_vm4, %v911_v14, %v910_v0  ;;  %v870_v27 = vsel %vm819_vm4, %v869_v15, %v868_v2  ;;  %v826_v40 = vsel %vm819_vm4, %v825_v16, %v824_v39  ;;  %v653_v28 = vrot.slane %v652_v20, 4 }
  0x80   : > { %v918_v10 = vsel %vm829_vm1, %v912_v26, 0.0  ;;  %v876_v17 = vsel %vm829_vm1, %v870_v27, 0.0  ;;  %v833_v21 = vsel %vm829_vm1, %v826_v40, 0.0  ;;  %v646_v32 = vrot.slane %v645_v8, 2 }
  0x81   : > { %919 = vadd.xlane.f32.xlu2 %v918_v10  ;;  %877 = vadd.xlane.f32.xlu1 %v876_v17  ;;  %v654_v33 = vadd.f32 %v653_v28, %v652_v20  ;;  %v662_v18 = vrot.slane %v661_v22, 4  ;;  %v670_v37 = vadd.f32 %v669_v24, %v668_v23  ;;  %v589_v19 = vmul.f32 %v2231_v25, %v2409_v46 }
  0x82   : > { %834 = vadd.xlane.f32.xlu0 %v833_v21  ;;  %v647_v41 = vadd.f32 %v646_v32, %v645_v8  ;;  %v590_v42 = vmul.f32 %v2244_v29, %v2413_v1  ;;  %v591_v45 = vmul.f32 %v2246_v30, %v2409_v46  ;;  %v592_v63 = vmul.f32 %v2248_v31, %v2413_v1 }
  0x83   : > { %v655_v43 = vrot.slane %v654_v33, 2  ;;  %v663_v0 = vadd.f32 %v662_v18, %v661_v22  ;;  %v671_v2 = vrot.slane %v670_v37, 4  ;;  %v593_v58 = vmul.f32 %v2258_v34, %v2409_v46 }
  0x84   : > { %v648_v6 = vrot.slane %v647_v41, 1  ;;  %v594_v62 = vmul.f32 %v2260_v35, %v2413_v1  ;;  %v595_v38 = vmul.f32 %v2262_v36, %v2409_v46  ;;  %v596_v3 = vmul.f32 %v2282_v44, %v2413_v1 }
  0x85   : > { %v656_v39 = vadd.f32 %v655_v43, %v654_v33  ;;  %v664_v12 = vrot.slane %v663_v0, 2  ;;  %v672_v5 = vadd.f32 %v671_v2, %v670_v37  ;;  %v605_v7 = vsel %vm2823_vm10, %v589_v19, 0.0 }
  0x86   : > { %v2480_v13 = vadd.f32 %v648_v6, %v647_v41  ;;  %v606_v14 = vsel %vm2824_vm0, %v590_v42, 0.0  ;;  %v614_v15 = vsel %vm2825_vm14, %v591_v45, 0.0  ;;  %v615_v16 = vsel %vm2826_vm2, %v592_v63, 0.0 }
  0x87   : > { %v657_v20 = vrot.slane %v656_v39, 1  ;;  %v665_v8 = vadd.f32 %v664_v12, %v663_v0  ;;  %v673_v22 = vrot.slane %v672_v5, 2  ;;  %v607_v46 = vadd.f32 %v606_v14, %v605_v7 }
  0x88   : > { %v925_v1 = vmul.f32 %v2319_v59, %v2480_v13  ;;  %v616_v23 = vadd.f32 %v615_v16, %v614_v15  ;;  %v623_v24 = vsel %vm2827_vm5, %v593_v58, 0.0  ;;  %v624_v26 = vsel %vm2828_vm7, %v594_v62, 0.0 }
  0x89   : > { %v2489_v27 = vadd.f32 %v657_v20, %v656_v39  ;;  %v666_v40 = vrot.slane %v665_v8, 1  ;;  %v674_v28 = vadd.f32 %v673_v22, %v672_v5  ;;  %v608_v10 = vrot.slane %v607_v46, 4 }
  0x8a   : > { %v617_v17 = vrot.slane %v616_v23, 4  ;;  %v625_v21 = vadd.f32 %v624_v26, %v623_v24  ;;  %v632_v32 = vsel %vm2829_vm9, %v595_v38, 0.0  ;;  %v633_v33 = vsel %vm2830_vm8, %v596_v3, 0.0 }
  0x8b   : > { %v2493_v18 = vadd.f32 %v666_v40, %v665_v8  ;;  %v675_v37 = vrot.slane %v674_v28, 1  ;;  %v926_v19 = vmul.f32 %v2319_v59, %v2489_v27  ;;  %v609_v41 = vadd.f32 %v608_v10, %v607_v46 }
  0x8c   : > { %v618_v42 = vadd.f32 %v617_v17, %v616_v23  ;;  %v626_v45 = vrot.slane %v625_v21, 4  ;;  %v634_v63 = vadd.f32 %v633_v33, %v632_v32  ;;  %v961_v43 = vmul.f32 %v2324_v60, %v2480_v13 }
  0x8d   : > { %v2499_v0 = vadd.f32 %v675_v37, %v674_v28  ;;  %v927_v2 = vmul.f32 %v2319_v59, %v2493_v18  ;;  %v943_v58 = vrot.slane %v926_v19, 7  ;;  %v610_v6 = vrot.slane %v609_v41, 2 }
  0x8e   : > { %v619_v62 = vrot.slane %v618_v42, 2  ;;  %v627_v38 = vadd.f32 %v626_v45, %v625_v21  ;;  %v635_v3 = vrot.slane %v634_v63, 4  ;;  %v962_v39 = vmul.f32 %v2324_v60, %v2489_v27 }
  0x8f   : > { %v928_v12 = vmul.f32 %v2319_v59, %v2499_v0  ;;  %v944_v5 = vsel %vm813_vm13, %v943_v58, %v925_v1  ;;  %v945_v7 = vrot.slane %v927_v2, 6  ;;  %v611_v14 = vadd.f32 %v610_v6, %v609_v41 }
  0x90   : > { %v620_v15 = vadd.f32 %v619_v62, %v618_v42  ;;  %v628_v16 = vrot.slane %v627_v38, 2  ;;  %v636_v20 = vadd.f32 %v635_v3, %v634_v63  ;;  %v963_v8 = vmul.f32 %v2324_v60, %v2493_v18 }
  0x91   : > { %v946_v22 = vsel %vm816_vm3, %v945_v7, %v944_v5  ;;  %v947_v46 = vrot.slane %v928_v12, 5  ;;  %v612_v23 = vrot.slane %v611_v14, 1  ;;  %v2513_v24 = vmul.f32 %v2324_v60, %v2499_v0 }
  0x92   : > { %v621_v26 = vrot.slane %v620_v15, 1  ;;  %v629_v40 = vadd.f32 %v628_v16, %v627_v38  ;;  %v637_v28 = vrot.slane %v636_v20, 2  ;;  %v979_v1 = vrot.slane %v962_v39, 7 }
  0x93   : > { %v948_v10 = vsel %vm819_vm4, %v947_v46, %v946_v22  ;;  %v613_v17 = vadd.f32 %v612_v23, %v611_v14  ;;  %v981_v21 = vrot.slane %v963_v8, 6  ;;  %v983_v45 = vrot.slane %v2513_v24, 5 }
  0x94   : > { %v954_v32 = vsel %vm829_vm1, %v948_v10, 0.0  ;;  %v622_v33 = vadd.f32 %v621_v26, %v620_v15  ;;  %v630_v37 = vrot.slane %v629_v40, 1  ;;  %v638_v19 = vadd.f32 %v637_v28, %v636_v20 }
  0x95   : > { %955 = vadd.xlane.f32.xlu1 %v954_v32  ;;  %v921_v41 = vmul.f32 %v2319_v59, %v613_v17  ;;  %v980_v42 = vsel %vm813_vm13, %v979_v1, %v961_v43  ;;  %v957_v62 = vmul.f32 %v2324_v60, %v613_v17  ;;  %v993_v38 = vmul.f32 %v2332_v61, %v613_v17 }
  0x96   : > { %v631_v63 = vadd.f32 %v630_v37, %v629_v40  ;;  %v639_v2 = vrot.slane %v638_v19, 1  ;;  %v922_v58 = vmul.f32 %v2319_v59, %v622_v33  ;;  %v958_v6 = vmul.f32 %v2324_v60, %v622_v33 }
  0x97   : > { %v994_v3 = vmul.f32 %v2332_v61, %v622_v33  ;;  %v982_v39 = vsel %vm816_vm3, %v981_v21, %v980_v42  ;;  %v998_v20 = vmul.f32 %v2332_v61, %v2489_v27  ;;  %v997_v33 = vmul.f32 %v2332_v61, %v2480_v13 }
  0x98   : > { %v640_v12 = vadd.f32 %v639_v2, %v638_v19  ;;  %v923_v5 = vmul.f32 %v2319_v59, %v631_v63  ;;  %v937_v43 = vrot.slane %v922_v58, 7  ;;  %v959_v7 = vmul.f32 %v2324_v60, %v631_v63 }
  0x99   : > { %v973_v14 = vrot.slane %v958_v6, 7  ;;  %v995_v15 = vmul.f32 %v2332_v61, %v631_v63  ;;  %v1009_v16 = vrot.slane %v994_v3, 7  ;;  %v999_v37 = vmul.f32 %v2332_v61, %v2493_v18 }
  0x9a   : > { %v924_v8 = vmul.f32 %v2319_v59, %v640_v12  ;;  %v938_v22 = vsel %vm813_vm13, %v937_v43, %v921_v41  ;;  %v939_v46 = vrot.slane %v923_v5, 6  ;;  %v960_v23 = vmul.f32 %v2324_v60, %v640_v12 }
  0x9b   : > { %v974_v24 = vsel %vm813_vm13, %v973_v14, %v957_v62  ;;  %v975_v26 = vrot.slane %v959_v7, 6  ;;  %v996_v40 = vmul.f32 %v2332_v61, %v640_v12  ;;  %v1010_v28 = vsel %vm813_vm13, %v1009_v16, %v993_v38 }
  0x9c   : > { %v940_v1 = vsel %vm816_vm3, %v939_v46, %v938_v22  ;;  %v941_v10 = vrot.slane %v924_v8, 5  ;;  %v977_v17 = vrot.slane %v960_v23, 5  ;;  %v1011_v21 = vrot.slane %v995_v15, 6 }
  0x9d   : > { %v976_v27 = vsel %vm816_vm3, %v975_v26, %v974_v24  ;;  %v1013_v32 = vrot.slane %v996_v40, 5  ;;  %v1000_v63 = vmul.f32 %v2332_v61, %v2499_v0  ;;  %v1015_v62 = vrot.slane %v998_v20, 7 }
  0x9e   : > { %v942_v19 = vsel %vm819_vm4, %v941_v10, %v940_v1  ;;  %v978_v41 = vsel %vm819_vm4, %v977_v17, %v976_v27  ;;  %v1012_v42 = vsel %vm816_vm3, %v1011_v21, %v1010_v28  ;;  %v1017_v18 = vrot.slane %v999_v37, 6 }
  0x9f   : > { %v951_v2 = vsel %vm829_vm1, %v942_v19, 0.0  ;;  %v987_v58 = vsel %vm829_vm1, %v978_v41, 0.0  ;;  %v1014_v6 = vsel %vm819_vm4, %v1013_v32, %v1012_v42  ;;  %v1019_v38 = vrot.slane %v1000_v63, 5 }
  0xa0   : > { %952 = vadd.xlane.f32.xlu0 %v951_v2  ;;  %988 = vadd.xlane.f32.xlu2 %v987_v58  ;;  %v1023_v13 = vsel %vm829_vm1, %v1014_v6, 0.0  ;;  %vm677_vm11 = vcmp.ge.s32.totalorder %v2192_v9, 2  ;;  %v1016_v3 = vsel %vm813_vm13, %v1015_v62, %v997_v33  ;;  %vm678_vm12 = vcmp.ge.s32.totalorder %v2194_v11, 2 }
  0xa1   : > { %1024 = vadd.xlane.f32.xlu1 %v1023_v13  ;;  %vm679_vm10 = vcmp.lt.s32.totalorder %v2192_v9, 34  ;;  %vm680_vm0 = vcmp.lt.s32.totalorder %v2194_v11, 34  ;;  %v984_v0 = vsel %vm819_vm4, %v983_v45, %v982_v39  ;;  %v1018_v12 = vsel %vm816_vm3, %v1017_v18, %v1016_v3 }
  0xa2   : > { %vm681_vm14 = vmand %vm677_vm11, %vm679_vm10  ;;  %v1020_v5 = vsel %vm819_vm4, %v1019_v38, %v1018_v12  ;;  %v990_v43 = vsel %vm829_vm1, %v984_v0, 0.0 }
  0xa3   : > { %vm682_vm2 = vmand %vm678_vm12, %vm680_vm0  ;;  %v1026_v7 = vsel %vm829_vm1, %v1020_v5, 0.0 }
  0xa4   : > { %vm683_vm5 = vmand %vm681_vm14, %vm478_vm6 }
  0xa5   : > { %vm684_vm7 = vmand %vm682_vm2, %vm479_vm15  ;;  %v1756_v9 = vsel %vm683_vm5, 1.0, %v2033_v57 }
  0xa6   : > { %v1757_v11 = vsel %vm684_vm7, 1.0, %v2033_v57  ;;  %v697_v45 = vmul.f32 %v2287_v48, %v1756_v9  ;;  %v699_v39 = vmul.f32 %v2291_v50, %v1756_v9  ;;  %v701_v14 = vmul.f32 %v2298_v53, %v1756_v9  ;;  %vm2831_vm6 = vmmov %vm2830_vm8 }
  0xa7   : > { %v698_v47 = vmul.f32 %v2289_v49, %v1757_v11  ;;  %v700_v15 = vmul.f32 %v2296_v52, %v1757_v11  ;;  %v702_v16 = vmul.f32 %v2305_v54, %v1757_v11  ;;  %v703_v20 = vmul.f32 %v2307_v55, %v1756_v9  ;;  %vm2832_vm15 = vmmov %vm2831_vm6 }
  0xa8   : > { %991 = vadd.xlane.f32.xlu0 %v990_v43  ;;  %1027 = vadd.xlane.f32.xlu2 %v1026_v7  ;;  %v704_v51 = vmul.f32 %v2309_v56, %v1757_v11  ;;  %v741_v57 = vsel %vm2831_vm6, %v697_v45, 0.0  ;;  %v750_v48 = vsel %vm2832_vm15, %v699_v39, 0.0  ;;  %vm2833_vm9 = vmmov %vm2831_vm6  ;;  %v689_v23 = vmul.f32 %v2231_v25, %v1756_v9 }
  0xa9   : > { %v759_v50 = vsel %vm2833_vm9, %v701_v14, 0.0  ;;  %vm2834_vm8 = vmmov %vm2831_vm6  ;;  %v690_v24 = vmul.f32 %v2244_v29, %v1757_v11  ;;  %v691_v26 = vmul.f32 %v2246_v30, %v1756_v9  ;;  %v692_v10 = vmul.f32 %v2248_v31, %v1757_v11 }
  0xaa   : > { %v742_v53 = vsel %vm2834_vm8, %v698_v47, 0.0  ;;  %vm2835_vm11 = vmmov %vm2831_vm6  ;;  %v693_v21 = vmul.f32 %v2258_v34, %v1756_v9  ;;  %v694_v27 = vmul.f32 %v2260_v35, %v1757_v11  ;;  %v695_v32 = vmul.f32 %v2262_v36, %v1756_v9 }
  0xab   : > { %v751_v49 = vsel %vm2835_vm11, %v700_v15, 0.0  ;;  %vm2836_vm12 = vmmov %vm2831_vm6  ;;  %v743_v8 = vadd.f32 %v742_v53, %v741_v57  ;;  %v696_v25 = vmul.f32 %v2282_v44, %v1757_v11  ;;  %vm1206_vm11 = vcmask 130048  }
  0xac   : > { %v760_v52 = vsel %vm2836_vm12, %v702_v16, 0.0  ;;  %vm2837_vm10 = vmmov %vm2831_vm6  ;;  %v752_v55 = vadd.f32 %v751_v49, %v750_v48  ;;  %vm1208_vm12 = vcmask 162816  }
  0xad   : > { %v768_v54 = vsel %vm2837_vm10, %v703_v20, 0.0  ;;  %v761_v22 = vadd.f32 %v760_v52, %v759_v50  ;;  %vm2838_vm0 = vmmov %vm2831_vm6  ;;  %v744_v40 = vrot.slane %v743_v8, 4  ;;  %vm1210_vm10 = vcmask 195584  }
  0xae   : > { %v769_v46 = vsel %vm2838_vm0, %v704_v51, 0.0  ;;  %v753_v28 = vrot.slane %v752_v55, 4  ;;  %vm2839_vm14 = vmmov %vm2838_vm0 }
  0xaf   : > { %v770_v56 = vadd.f32 %v769_v46, %v768_v54  ;;  %v762_v1 = vrot.slane %v761_v22, 4  ;;  %v745_v33 = vadd.f32 %v744_v40, %v743_v8  ;;  %v705_v30 = vsel %vm2839_vm14, %v689_v23, 0.0  ;;  %vm2840_vm2 = vmmov %vm2838_vm0 }
  0xb0   : > { %v754_v37 = vadd.f32 %v753_v28, %v752_v55  ;;  %v706_v41 = vsel %vm2840_vm2, %v690_v24, 0.0  ;;  %vm2841_vm5 = vmmov %vm2838_vm0  ;;  %vm1216_vm14 = vcmask 287744  }
  0xb1   : > { %v771_v17 = vrot.slane %v770_v56, 4  ;;  %v763_v19 = vadd.f32 %v762_v1, %v761_v22  ;;  %v714_v42 = vsel %vm2841_vm5, %v691_v26, 0.0  ;;  %v746_v31 = vrot.slane %v745_v33, 2  ;;  %vm2842_vm7 = vmmov %vm2838_vm0 }
  0xb2   : > { %v755_v63 = vrot.slane %v754_v37, 2  ;;  %v707_v34 = vadd.f32 %v706_v41, %v705_v30  ;;  %v715_v35 = vsel %vm2842_vm7, %v692_v10, 0.0  ;;  %vm2843_vm6 = vmmov %vm2838_vm0 }
  0xb3   : > { %v772_v29 = vadd.f32 %v771_v17, %v770_v56  ;;  %v764_v2 = vrot.slane %v763_v19, 2  ;;  %v723_v36 = vsel %vm2843_vm6, %v693_v21, 0.0  ;;  %vm2844_vm15 = vmmov %vm2838_vm0  ;;  %v747_v62 = vadd.f32 %v746_v31, %v745_v33 }
  0xb4   : > { %v724_v6 = vsel %vm2844_vm15, %v694_v27, 0.0  ;;  %v756_v44 = vadd.f32 %v755_v63, %v754_v37  ;;  %v708_v18 = vrot.slane %v707_v34, 4  ;;  %v716_v3 = vadd.f32 %v715_v35, %v714_v42  ;;  %vm2845_vm9 = vmmov %vm2838_vm0 }
  0xb5   : > { %v773_v58 = vrot.slane %v772_v29, 2  ;;  %v765_v13 = vadd.f32 %v764_v2, %v763_v19  ;;  %v725_v0 = vadd.f32 %v724_v6, %v723_v36  ;;  %v732_v12 = vsel %vm2845_vm9, %v695_v32, 0.0  ;;  %vm2846_vm8 = vmmov %vm2838_vm0 }
  0xb6   : > { %v748_v5 = vrot.slane %v747_v62, 1  ;;  %v757_v43 = vrot.slane %v756_v44, 1  ;;  %v709_v9 = vadd.f32 %v708_v18, %v707_v34  ;;  %v717_v45 = vrot.slane %v716_v3, 4 }
  0xb7   : > { %v774_v38 = vadd.f32 %v773_v58, %v772_v29  ;;  %v766_v7 = vrot.slane %v765_v13, 1  ;;  %v726_v39 = vrot.slane %v725_v0, 4  ;;  %v733_v14 = vsel %vm2846_vm8, %v696_v25, 0.0 }
  0xb8   : > { %v749_v47 = vadd.f32 %v748_v5, %v747_v62  ;;  %v758_v15 = vadd.f32 %v757_v43, %v756_v44  ;;  %v710_v20 = vrot.slane %v709_v9, 2  ;;  %v718_v57 = vadd.f32 %v717_v45, %v716_v3 }
  0xb9   : > { %v775_v11 = vrot.slane %v774_v38, 1  ;;  %v767_v16 = vadd.f32 %v766_v7, %v765_v13  ;;  %v727_v48 = vadd.f32 %v726_v39, %v725_v0  ;;  %v734_v50 = vadd.f32 %v733_v14, %v732_v12 }
  0xba   : > { %v1033_v53 = vmul.f32 %v2319_v59, %v749_v47  ;;  %v1034_v49 = vmul.f32 %v2319_v59, %v758_v15  ;;  %v711_v54 = vadd.f32 %v710_v20, %v709_v9  ;;  %v719_v55 = vrot.slane %v718_v57, 2 }
  0xbb   : > { %v776_v51 = vadd.f32 %v775_v11, %v774_v38  ;;  %v1035_v52 = vmul.f32 %v2319_v59, %v767_v16  ;;  %v728_v22 = vrot.slane %v727_v48, 2  ;;  %v735_v46 = vrot.slane %v734_v50, 4 }
  0xbc   : > { %v1051_v56 = vrot.slane %v1034_v49, 7  ;;  %v712_v24 = vrot.slane %v711_v54, 1  ;;  %v1069_v26 = vmul.f32 %v2324_v60, %v749_v47  ;;  %v720_v28 = vadd.f32 %v719_v55, %v718_v57 }
  0xbd   : > { %v1036_v8 = vmul.f32 %v2319_v59, %v776_v51  ;;  %v1053_v23 = vrot.slane %v1035_v52, 6  ;;  %v729_v1 = vadd.f32 %v728_v22, %v727_v48  ;;  %v736_v10 = vadd.f32 %v735_v46, %v734_v50 }
  0xbe   : > { %v1052_v17 = vsel %vm813_vm13, %v1051_v56, %v1033_v53  ;;  %v713_v21 = vadd.f32 %v712_v24, %v711_v54  ;;  %v1070_v27 = vmul.f32 %v2324_v60, %v758_v15  ;;  %v1071_v32 = vmul.f32 %v2324_v60, %v767_v16 }
  0xbf   : > { %v1055_v40 = vrot.slane %v1036_v8, 5  ;;  %v1054_v33 = vsel %vm816_vm3, %v1053_v23, %v1052_v17  ;;  %v721_v37 = vrot.slane %v720_v28, 1  ;;  %v730_v19 = vrot.slane %v729_v1, 1 }
  0xc0   : > { %v737_v25 = vrot.slane %v736_v10, 2  ;;  %v1029_v30 = vmul.f32 %v2319_v59, %v713_v21  ;;  %v1065_v41 = vmul.f32 %v2324_v60, %v713_v21  ;;  %v1072_v42 = vmul.f32 %v2324_v60, %v776_v51 }
  0xc1   : > { %v1056_v29 = vsel %vm819_vm4, %v1055_v40, %v1054_v33  ;;  %v722_v63 = vadd.f32 %v721_v37, %v720_v28  ;;  %v731_v2 = vadd.f32 %v730_v19, %v729_v1  ;;  %v1087_v58 = vrot.slane %v1070_v27, 7 }
  0xc2   : > { %v1062_v31 = vsel %vm829_vm1, %v1056_v29, 0.0  ;;  %v738_v34 = vadd.f32 %v737_v25, %v736_v10  ;;  %v1089_v35 = vrot.slane %v1071_v32, 6  ;;  %v1091_v36 = vrot.slane %v1072_v42, 5 }
  0xc3   : > { %1063 = vadd.xlane.f32.xlu1 %v1062_v31  ;;  %v1105_v6 = vmul.f32 %v2332_v61, %v749_v47  ;;  %v1030_v44 = vmul.f32 %v2319_v59, %v722_v63  ;;  %v1031_v13 = vmul.f32 %v2319_v59, %v731_v2  ;;  %v1066_v18 = vmul.f32 %v2324_v60, %v722_v63 }
  0xc4   : > { %v739_v62 = vrot.slane %v738_v34, 1  ;;  %v1067_v38 = vmul.f32 %v2324_v60, %v731_v2  ;;  %v1088_v3 = vsel %vm813_vm13, %v1087_v58, %v1069_v26  ;;  %v1106_v0 = vmul.f32 %v2332_v61, %v758_v15 }
  0xc5   : > { %v1107_v12 = vmul.f32 %v2332_v61, %v767_v16  ;;  %v1045_v43 = vrot.slane %v1030_v44, 7  ;;  %v1047_v7 = vrot.slane %v1031_v13, 6  ;;  %v1081_v9 = vrot.slane %v1066_v18, 7 }
  0xc6   : > { %v740_v5 = vadd.f32 %v739_v62, %v738_v34  ;;  %v1083_v11 = vrot.slane %v1067_v38, 6  ;;  %v1090_v45 = vsel %vm816_vm3, %v1089_v35, %v1088_v3  ;;  %v1108_v39 = vmul.f32 %v2332_v61, %v776_v51 }
  0xc7   : > { %v1123_v14 = vrot.slane %v1106_v0, 7  ;;  %v1046_v20 = vsel %vm813_vm13, %v1045_v43, %v1029_v30  ;;  %v1082_v15 = vsel %vm813_vm13, %v1081_v9, %v1065_v41  ;;  %v1092_v50 = vsel %vm819_vm4, %v1091_v36, %v1090_v45 }
  0xc8   : > { %v1032_v47 = vmul.f32 %v2319_v59, %v740_v5  ;;  %v1068_v57 = vmul.f32 %v2324_v60, %v740_v5  ;;  %v1048_v16 = vsel %vm816_vm3, %v1047_v7, %v1046_v20  ;;  %v1084_v48 = vsel %vm816_vm3, %v1083_v11, %v1082_v15 }
  0xc9   : > { %v1124_v53 = vsel %vm813_vm13, %v1123_v14, %v1105_v6  ;;  %v1125_v51 = vrot.slane %v1107_v12, 6  ;;  %v1127_v54 = vrot.slane %v1108_v39, 5  ;;  %v1101_v59 = vmul.f32 %v2332_v61, %v713_v21 }
  0xca   : > { %v1049_v49 = vrot.slane %v1032_v47, 5  ;;  %v1085_v52 = vrot.slane %v1068_v57, 5  ;;  %v1102_v8 = vmul.f32 %v2332_v61, %v722_v63  ;;  %v1103_v60 = vmul.f32 %v2332_v61, %v731_v2 }
  0xcb   : > { %v1126_v46 = vsel %vm816_vm3, %v1125_v51, %v1124_v53  ;;  %v1104_v56 = vmul.f32 %v2332_v61, %v740_v5  ;;  %v1098_v61 = vsel %vm829_vm1, %v1092_v50, 0.0  ;;  %v1146_v58 = vadd.s32 4294967292, %v2189_v4 }
  0xcc   : > { %v1050_v55 = vsel %vm819_vm4, %v1049_v49, %v1048_v16  ;;  %v1086_v22 = vsel %vm819_vm4, %v1085_v52, %v1084_v48  ;;  %v1128_v26 = vsel %vm819_vm4, %v1127_v54, %v1126_v46  ;;  %v1117_v40 = vrot.slane %v1102_v8, 7 }
  0xcd   : > { %v1059_v23 = vsel %vm829_vm1, %v1050_v55, 0.0  ;;  %v1095_v24 = vsel %vm829_vm1, %v1086_v22, 0.0  ;;  %v1119_v28 = vrot.slane %v1103_v60, 6  ;;  %v1121_v1 = vrot.slane %v1104_v56, 5 }
  0xce   : > { %1060 = vadd.xlane.f32.xlu0 %v1059_v23  ;;  %1096 = vadd.xlane.f32.xlu2 %v1095_v24  ;;  %v1118_v10 = vsel %vm813_vm13, %v1117_v40, %v1101_v59  ;;  %v1134_v32 = vsel %vm829_vm1, %v1128_v26, 0.0  ;;  %v1160_v6 = vadd.s32 4294967284, %v2189_v4  ;;  %v1153_v44 = vadd.s32 4294967288, %v2189_v4 }
  0xcf   : > { %v1120_v17 = vsel %vm816_vm3, %v1119_v28, %v1118_v10  ;;  %vm1200_vm3 = vcmask 31744   ;;  %v1167_v0 = vadd.s32 4294967280, %v2189_v4  ;;  %v1174_v7 = vadd.s32 4294967276, %v2189_v4  ;;  %v1137_v10 = vld [vmem:[#allocation2] sm:$0x3] }
  0xd0   : > { %v1122_v21 = vsel %vm819_vm4, %v1121_v1, %v1120_v17  ;;  %v1181_v45 = vadd.s32 4294967272, %v2189_v4  ;;  %vm1202_vm4 = vcmask 64512   ;;  %v1195_v50 = vadd.s32 4294967264, %v2189_v4 }
  0xd1   : > { %v1131_v27 = vsel %vm829_vm1, %v1122_v21, 0.0  ;;  %vm1204_vm1 = vcmask 97280   ;;  %v1188_v54 = vadd.s32 4294967268, %v2189_v4  ;;  %vm1212_vm0 = vcmask 228352  }
  0xd2   : > { %1132 = vadd.xlane.f32.xlu1 %v1131_v27 }
  0xd6   : > { %1099 = vadd.xlane.f32.xlu0 %v1098_v61  ;;  %1135 = vadd.xlane.f32.xlu2 %v1134_v32 }
  0xe1   : > { %v917_v37 = vpop.xlane.xlu2 %916 }
  0xe2   : > { %v875_v33 = vpop.xlane.xlu1 %874  ;;  %v1154_v9 = vperm.slane %v917_v37, %v1153_v44 }
  0xe3   : > { %v1147_v13 = vperm.slane %v875_v33, %v1146_v58 }
  0xe4   : > { %v832_v19 = vpop.xlane.xlu0 %831 }
  0xe5   : > { %v1140_v18 = vperm.slane %v832_v19, %v2189_v4 }
  0xf4   : > { %v878_v25 = vpop.xlane.xlu1 %877  ;;  %v920_v29 = vpop.xlane.xlu2 %919 }
  0xf5   : > { %v835_v30 = vpop.xlane.xlu0 %834  ;;  %v1148_v35 = vperm.slane %v878_v25, %v1146_v58  ;;  %v1155_v38 = vperm.slane %v920_v29, %v1153_v44 }
  0xf6   : > { %v1141_v36 = vperm.slane %v835_v30, %v2189_v4 }
  0xf7   : > { %v1149_v3 = vsel %vm813_vm13, %v1148_v35, %v1147_v13  ;;  %v1156_v47 = vsel %vm813_vm13, %v1155_v38, %v1154_v9 }
  0xf8   : > { %v1142_v12 = vsel %vm813_vm13, %v1141_v36, %v1140_v18 }
  0xf9   : > { %v1201_v20 = vsel %vm1200_vm3, %v1142_v12, %v1149_v3 }
  0xfa   : > { %v1203_v51 = vsel %vm1202_vm4, %v1201_v20, %v1156_v47 }
 0x108   : > { %v956_v41 = vpop.xlane.xlu1 %955 }
 0x109   : > { %v1162_v5 = vperm.slane %v956_v41, %v1160_v6 }
 0x113   : > { %v953_v42 = vpop.xlane.xlu0 %952  ;;  %v989_v31 = vpop.xlane.xlu2 %988 }
 0x114   : > { %v1025_v63 = vpop.xlane.xlu1 %1024  ;;  %v1161_v43 = vperm.slane %v953_v42, %v1160_v6  ;;  %v1168_v57 = vperm.slane %v989_v31, %v1167_v0 }
 0x115   : > { %v1175_v16 = vperm.slane %v1025_v63, %v1174_v7 }
 0x116   : > { %v1163_v15 = vsel %vm813_vm13, %v1162_v5, %v1161_v43 }
 0x117   : > { %v1205_v8 = vsel %vm1204_vm1, %v1203_v51, %v1163_v15 }
 0x11b   : > { %v992_v2 = vpop.xlane.xlu0 %991  ;;  %v1028_v34 = vpop.xlane.xlu2 %1027 }
 0x11c   : > { %v1169_v11 = vperm.slane %v992_v2, %v1167_v0  ;;  %v1176_v48 = vperm.slane %v1028_v34, %v1174_v7 }
 0x11e   : > { %v1170_v53 = vsel %vm813_vm13, %v1169_v11, %v1168_v57  ;;  %v1177_v55 = vsel %vm813_vm13, %v1176_v48, %v1175_v16 }
 0x11f   : > { %v1207_v60 = vsel %vm1206_vm11, %v1205_v8, %v1170_v53 }
 0x120   : > { %v1209_v28 = vsel %vm1208_vm12, %v1207_v60, %v1177_v55 }
 0x136   : > { %v1064_v62 = vpop.xlane.xlu1 %1063 }
 0x137   : > { %v1183_v49 = vperm.slane %v1064_v62, %v1181_v45 }
 0x141   : > { %v1061_v39 = vpop.xlane.xlu0 %1060  ;;  %v1097_v14 = vpop.xlane.xlu2 %1096 }
 0x142   : > { %v1182_v52 = vperm.slane %v1061_v39, %v1181_v45  ;;  %v1189_v24 = vperm.slane %v1097_v14, %v1188_v54 }
 0x144   : > { %v1184_v46 = vsel %vm813_vm13, %v1183_v49, %v1182_v52 }
 0x145   : > { %v1133_v59 = vpop.xlane.xlu1 %1132  ;;  %v1211_v1 = vsel %vm1210_vm10, %v1209_v28, %v1184_v46 }
 0x146   : > { %v1196_v22 = vperm.slane %v1133_v59, %v1195_v50 }
 0x149   : > { %v1100_v56 = vpop.xlane.xlu0 %1099  ;;  %v1136_v23 = vpop.xlane.xlu2 %1135 }
 0x14a   : > { %v1190_v26 = vperm.slane %v1100_v56, %v1188_v54  ;;  %v1197_v40 = vperm.slane %v1136_v23, %v1195_v50 }
 0x14c   : > { %v1191_v4 = vsel %vm813_vm13, %v1190_v26, %v1189_v24  ;;  %v1198_v17 = vsel %vm813_vm13, %v1197_v40, %v1196_v22 }
 0x14d   : > { %v1213_v21 = vsel %vm1212_vm0, %v1211_v1, %v1191_v4  ;;  %1221 = sbr.rel (%p1761_p0) target bundleno = 767 (0x2ff), region = 76 }
 0x14e   : > { %v1214_v27 = vsel %vm2840_vm2, %v1213_v21, %v1198_v17 }
 0x14f   : > { %v1215_v61 = vadd.f32 %v1214_v27, %v1137_v10 }
 0x151   : > { %1217 = vst.msk [vmem:[#allocation2] sm:$0x3] %vm1216_vm14, %v1215_v61 }
 0x152   : > { %v1228_v32 = vld [vmem:[%s2773_s1 + $0x20] sm:$0xf]  ;;  %vm1233_vm5 = vcmask 1043456   ;;  %v1227_v33 = vld [vmem:[%s2773_s1 + $0x18] sm:$0xff]  ;;  %v1226_v37 = vld [vmem:[%s2773_s1 + $0x10] sm:$0xff]  ;;  %vm1229_vm13 = vcmask 293888  }
 0x153   : > { %1762 = vmatpush.msk.msra.mxu0 %vm1233_vm5, %v1228_v32  ;;  %v1287_v19 = vld [vmem:[#allocation7 + $0xf0] sm:$0xff]  ;;  %v1288_v25 = vld [vmem:[#allocation7 + $0xf8] sm:$0xff]  ;;  %v1289_v29 = vld [vmem:[#allocation7 + $0x100] sm:$0xff]  ;;  %vm2847_vm7 = vcmask 261120   ;;  %vm1548_vm10 = vcmask 1041408   ;;  %vm1575_vm0 = vcmask 33792  }
 0x154   : > { %1312 = vmatpush.msra.mxu1 %v1287_v19  ;;  %v1277_v41 = vld [vmem:[#allocation7 + $0xa0] sm:$0xff]  ;;  %v1278_v42 = vld [vmem:[#allocation7 + $0xa8] sm:$0xff]  ;;  %1332 = vmatpush.msra.mxu2 %v1288_v25  ;;  %v1279_v63 = vld [vmem:[#allocation7 + $0xb0] sm:$0xff]  ;;  %vm1651_vm14 = vcmask 7168   ;;  %vm1653_vm2 = vcmask 9216  }
 0x155   : > { %1249 = vmatpush.msra.mxu0 %v1227_v33  ;;  %v1225_v31 = vld [vmem:[%s2773_s1 + $0x8] sm:$0xff]  ;;  %1352 = vmatpush.msra.mxu3 %v1289_v29  ;;  %v1267_v2 = vld [vmem:[#allocation7 + $0x50] sm:$0xff]  ;;  %v1268_v34 = vld [vmem:[#allocation7 + $0x58] sm:$0xff] }
 0x156   : > { %1313 = vmatpush.msra.mxu1 %v1277_v41  ;;  %v1269_v58 = vld [vmem:[#allocation7 + $0x60] sm:$0xff]  ;;  %1333 = vmatpush.msra.mxu2 %v1278_v42  ;;  %v1283_v62 = vld [vmem:[#allocation7 + $0xd0] sm:$0xff]  ;;  %v1258_v18 = vld [vmem:[#allocation7 + $0x8] sm:$0xff] }
 0x157   : > { %1250 = vmatpush.msra.mxu0 %v1226_v37  ;;  %v1224_v35 = vld [vmem:[%s2773_s1] sm:$0xff]  ;;  %1353 = vmatpush.msra.mxu3 %v1279_v63  ;;  %v1259_v38 = vld [vmem:[#allocation7 + $0x10] sm:$0xff]  ;;  %v1290_v12 = vld [vmem:[#allocation7 + $0x108] sm:$0xff] }
 0x158   : > { %v1222_v30 = vld [vmem:[#allocation2] sm:$0x3]  ;;  %1314 = vmatpush.msra.mxu1 %v1267_v2  ;;  %v1293_v6 = vld [vmem:[#allocation7 + $0x120] sm:$0xff]  ;;  %1334 = vmatpush.msra.mxu2 %v1268_v34  ;;  %v1263_v3 = vld [vmem:[#allocation7 + $0x30] sm:$0xff] }
 0x159   : > { %v1223_v36 = vmul.f32 0.00390625, %v1222_v30  ;;  %1251 = vmatpush.msra.mxu0 %v1225_v31  ;;  %1354 = vmatpush.msra.mxu3 %v1269_v58  ;;  %v1273_v44 = vld [vmem:[#allocation7 + $0x80] sm:$0xff]  ;;  %v1291_v0 = vld [vmem:[#allocation7 + $0x110] sm:$0xff]  ;;  %v1292_v5 = vld [vmem:[#allocation7 + $0x118] sm:$0xff] }
 0x15a   : > { %v1257_v13 = vld [vmem:[#allocation7] sm:$0xff]  ;;  %1335 = vmatpush.msra.mxu2 %v1258_v18  ;;  %v1280_v7 = vld [vmem:[#allocation7 + $0xb8] sm:$0xff]  ;;  %v1282_v9 = vld [vmem:[#allocation7 + $0xc8] sm:$0xff] }
 0x15b   : > { %1252 = vmatpush.msra.mxu0 %v1224_v35  ;;  %1315 = vmatpush.msra.mxu1 %v1257_v13  ;;  %v1281_v43 = vld [vmem:[#allocation7 + $0xc0] sm:$0xff]  ;;  %v1271_v11 = vld [vmem:[#allocation7 + $0x70] sm:$0xff]  ;;  %v1270_v45 = vld [vmem:[#allocation7 + $0x68] sm:$0xff] }
 0x15c   : > { %1763 = vmatmul.msk.f32.vlgmr.msra.gmra.mxu0 %vm1229_vm13, %v1223_v36  ;;  %1355 = vmatpush.msra.mxu3 %v1259_v38  ;;  %v1272_v39 = vld [vmem:[#allocation7 + $0x78] sm:$0xff]  ;;  %v1261_v14 = vld [vmem:[#allocation7 + $0x20] sm:$0xff]  ;;  %v1262_v20 = vld [vmem:[#allocation7 + $0x28] sm:$0xff] }
 0x15d   : > { %1432 = vmatpush.msrb.mxu0 %v1293_v6  ;;  %1392 = vmatpush.msrb.mxu2 %v1291_v0  ;;  %v1260_v47 = vld [vmem:[#allocation7 + $0x18] sm:$0xff]  ;;  %v1295_v15 = vld [vmem:[#allocation7 + $0x130] sm:$0xff]  ;;  %v1294_v16 = vld [vmem:[#allocation7 + $0x128] sm:$0xff] }
 0x15e   : > { %1372 = vmatpush.msrb.mxu1 %v1290_v12  ;;  %1412 = vmatpush.msrb.mxu3 %v1292_v5  ;;  %vm2848_vm6 = vmmov %vm2847_vm7  ;;  %v1296_v48 = vld [vmem:[#allocation7 + $0x138] sm:$0xff]  ;;  %v1285_v50 = vld [vmem:[#allocation7 + $0xe0] sm:$0xff] }
 0x15f   : > { %1433 = vmatpush.msrb.mxu0 %v1283_v62  ;;  %1393 = vmatpush.msrb.mxu2 %v1281_v43  ;;  %vm2849_vm15 = vmmov %vm2848_vm6  ;;  %v1284_v53 = vld [vmem:[#allocation7 + $0xd8] sm:$0xff]  ;;  %v1286_v49 = vld [vmem:[#allocation7 + $0xe8] sm:$0xff] }
 0x160   : > { %1373 = vmatpush.msrb.mxu1 %v1280_v7  ;;  %1413 = vmatpush.msrb.mxu3 %v1282_v9  ;;  %vm2850_vm9 = vmmov %vm2848_vm6  ;;  %v1275_v52 = vld [vmem:[#allocation7 + $0x90] sm:$0xff]  ;;  %v1274_v51 = vld [vmem:[#allocation7 + $0x88] sm:$0xff] }
 0x161   : > { %1434 = vmatpush.msrb.mxu0 %v1273_v44  ;;  %1394 = vmatpush.msrb.mxu2 %v1271_v11  ;;  %v1276_v54 = vld [vmem:[#allocation7 + $0x98] sm:$0xff]  ;;  %v1265_v59 = vld [vmem:[#allocation7 + $0x40] sm:$0xff]  ;;  %v1266_v60 = vld [vmem:[#allocation7 + $0x48] sm:$0xff] }
 0x162   : > { %1374 = vmatpush.msrb.mxu1 %v1270_v45  ;;  %1414 = vmatpush.msrb.mxu3 %v1272_v39  ;;  %v1264_v8 = vld [vmem:[#allocation7 + $0x38] sm:$0xff]  ;;  %vm2851_vm8 = vmmov %vm2848_vm6 }
 0x163   : > { %1435 = vmatpush.msrb.mxu0 %v1263_v3  ;;  %1395 = vmatpush.msrb.mxu2 %v1261_v14  ;;  %vm2852_vm3 = vmmov %vm2848_vm6  ;;  %v2697_v22 = vld [vmem:[%s2776_s4] sm:$0xff] }
 0x164   : > { %1375 = vmatpush.msrb.mxu1 %v1260_v47  ;;  %1415 = vmatpush.msrb.mxu3 %v1262_v20  ;;  %vm2853_vm4 = vmmov %vm2852_vm3  ;;  %v2702_v46 = vld [vmem:[%s2778_s6] sm:$0xff]  ;;  %v1518_v23 = vperm.slane %v2697_v22, 0  ;;  %v1519_v26 = vperm.slane %v2697_v22, 1  ;;  %v1520_v1 = vperm.slane %v2697_v22, 2  ;;  %v1521_v33 = vperm.slane %v2697_v22, 3 }
 0x165   : > { %vm2854_vm1 = vmmov %vm2852_vm3  ;;  %v1586_v24 = vperm.slane %v2702_v46, 0  ;;  %v1587_v40 = vperm.slane %v2702_v46, 1  ;;  %v1588_v4 = vperm.slane %v2702_v46, 2  ;;  %v1589_v29 = vperm.slane %v2702_v46, 3 }
 0x166   : > { %vm2855_vm11 = vmmov %vm2854_vm1  ;;  %v1522_v6 = vperm.slane %v2697_v22, 4  ;;  %v1590_v18 = vperm.slane %v2702_v46, 4  ;;  %v1523_v12 = vperm.slane %v2697_v22, 5  ;;  %v1591_v5 = vperm.slane %v2702_v46, 5 }
 0x167   : > { %vm2856_vm12 = vmmov %vm2854_vm1  ;;  %v1524_v7 = vperm.slane %v2697_v22, 6  ;;  %v1592_v9 = vperm.slane %v2702_v46, 6  ;;  %v1525_v20 = vperm.slane %v2697_v22, 7 }
 0x1d9   : > { %v1254_v57 = vpop.f32.mrf.mxu0 }
 0x1da   : > { %1764 = vmatmul.msk.f32.vlgmr.msra.gmra.mxu1 %vm2847_vm7, %v1254_v57  ;;  %1765 = vmatmul.msk.f32.vlgmr.msra.gmra.mxu2 %vm2848_vm6, %v1254_v57 }
 0x1db   : > { %1766 = vmatmul.msk.f32.vlgmr.msra.gmra.mxu3 %vm2849_vm15, %v1254_v57  ;;  %1770 = vmatmul.msk.f32.vlgmr.msrb.gmra.mxu0 %vm2850_vm9, %v1254_v57 }
 0x1dc   : > { %1472 = vmatpush.msra.mxu2 %v1295_v15  ;;  %1452 = vmatpush.msra.mxu1 %v1294_v16 }
 0x1dd   : > { %1492 = vmatpush.msra.mxu3 %v1296_v48 }
 0x1de   : > { %1473 = vmatpush.msra.mxu2 %v1285_v50  ;;  %1453 = vmatpush.msra.mxu1 %v1284_v53  ;;  %v1515_v53 = vld [vmem:[%s2776_s4 + $0x8] sm:$0x3] }
 0x1df   : > { %1493 = vmatpush.msra.mxu3 %v1286_v49  ;;  %v1583_v49 = vld [vmem:[%s2778_s6 + $0x8] sm:$0x3] }
 0x1e0   : > { %1474 = vmatpush.msra.mxu2 %v1275_v52  ;;  %1454 = vmatpush.msra.mxu1 %v1274_v51 }
 0x1e1   : > { %1494 = vmatpush.msra.mxu3 %v1276_v54 }
 0x1e2   : > { %1767 = vmatmul.msk.f32.vlgmr.msrb.gmra.mxu1 %vm2851_vm8, %v1254_v57  ;;  %1768 = vmatmul.msk.f32.vlgmr.msrb.gmra.mxu2 %vm2852_vm3, %v1254_v57 }
 0x1e3   : > { %1769 = vmatmul.msk.f32.vlgmr.msrb.gmra.mxu3 %vm2853_vm4, %v1254_v57  ;;  %1475 = vmatpush.msra.mxu2 %v1265_v59 }
 0x1e4   : > { %1455 = vmatpush.msra.mxu1 %v1264_v8  ;;  %1495 = vmatpush.msra.mxu3 %v1266_v60 }
 0x1ea   : > { %1771 = vmatmul.msk.f32.vlgmr.msra.gmra.mxu1 %vm2854_vm1, %v1254_v57  ;;  %1772 = vmatmul.msk.f32.vlgmr.msra.gmra.mxu2 %vm2855_vm11, %v1254_v57 }
 0x1eb   : > { %1773 = vmatmul.msk.f32.vlgmr.msra.gmra.mxu3 %vm2856_vm12, %v1254_v57  ;;  %v1593_v57 = vperm.slane %v2702_v46, 7 }
 0x257   : > { %v1317_v55 = vpop.f32.mrf.mxu1 }
 0x258   : > { %v1500_v56 = vmax.f32 %v1317_v55, 0.0  ;;  %v1437_v34 = vpop.f32.mrf.mxu0 }
 0x259   : > { %v1506_v43 = vmax.f32 %v1437_v34, 0.0 }
 0x25a   : > { %v1538_v10 = vmul.f32 %v1518_v23, %v1500_v56  ;;  %v1606_v17 = vmul.f32 %v1586_v24, %v1500_v56  ;;  %v1526_v23 = vperm.slane %v1515_v53, 0  ;;  %v1594_v24 = vperm.slane %v1583_v49, 0 }
 0x25b   : > { %v1544_v8 = vmul.f32 %v1524_v7, %v1506_v43  ;;  %v1612_v60 = vmul.f32 %v1592_v9, %v1506_v43 }
 0x25c   : > { %v1549_v42 = vsel %vm1548_vm10, %v1538_v10, 0.0  ;;  %v1616_v31 = vsel %vm1548_vm10, %v1606_v17, 0.0 }
 0x25d   : > { %v1337_v28 = vpop.f32.mrf.mxu2 }
 0x25e   : > { %v1501_v21 = vmax.f32 %v1337_v28, 0.0  ;;  %v1357_v27 = vpop.f32.mrf.mxu3 }
 0x25f   : > { %v1502_v61 = vmax.f32 %v1357_v27, 0.0  ;;  %v1377_v32 = vpop.f32.mrf.mxu1  ;;  %v1595_v27 = vperm.slane %v1583_v49, 1 }
 0x260   : > { %v1539_v37 = vmul.f32 %v1519_v26, %v1501_v21  ;;  %v1607_v19 = vmul.f32 %v1587_v40, %v1501_v21  ;;  %v1503_v25 = vmax.f32 %v1377_v32, 0.0  ;;  %v1527_v21 = vperm.slane %v1515_v53, 1 }
 0x261   : > { %v1540_v30 = vmul.f32 %v1520_v1, %v1502_v61  ;;  %v1608_v41 = vmul.f32 %v1588_v4, %v1502_v61  ;;  %v1560_v61 = vsel %vm1548_vm10, %v1544_v8, 0.0  ;;  %v1627_v32 = vsel %vm1548_vm10, %v1612_v60, 0.0 }
 0x262   : > { %v1550_v63 = vsel %vm1548_vm10, %v1539_v37, 0.0  ;;  %v1617_v2 = vsel %vm1548_vm10, %v1607_v19, 0.0  ;;  %v1541_v36 = vmul.f32 %v1521_v33, %v1503_v25  ;;  %v1609_v13 = vmul.f32 %v1589_v29, %v1503_v25 }
 0x263   : > { %v1551_v58 = vadd.f32 %v1550_v63, %v1549_v42  ;;  %v1618_v35 = vadd.f32 %v1617_v2, %v1616_v31  ;;  %v1552_v62 = vsel %vm1548_vm10, %v1540_v30, 0.0  ;;  %v1619_v44 = vsel %vm1548_vm10, %v1608_v41, 0.0 }
 0x264   : > { %v1554_v39 = vsel %vm1548_vm10, %v1541_v36, 0.0  ;;  %v1621_v15 = vsel %vm1548_vm10, %v1609_v13, 0.0 }
 0x265   : > { %v1553_v38 = vadd.f32 %v1552_v62, %v1551_v58  ;;  %v1620_v3 = vadd.f32 %v1619_v44, %v1618_v35  ;;  %v1397_v0 = vpop.f32.mrf.mxu2 }
 0x266   : > { %v1504_v11 = vmax.f32 %v1397_v0, 0.0  ;;  %v1417_v45 = vpop.f32.mrf.mxu3 }
 0x267   : > { %v1505_v14 = vmax.f32 %v1417_v45, 0.0  ;;  %v1457_v47 = vpop.f32.mrf.mxu1  ;;  %v1555_v52 = vadd.f32 %v1554_v39, %v1553_v38  ;;  %v1622_v51 = vadd.f32 %v1621_v15, %v1620_v3  ;;  %v1900_v38 = vld [vmem:[%s2777_s5] ss:$0 sm:$0xff]  ;;  %v1580_v39 = vstv %s1511_s27 }
 0x268   : > { %v1542_v16 = vmul.f32 %v1522_v6, %v1504_v11  ;;  %v1610_v48 = vmul.f32 %v1590_v18, %v1504_v11  ;;  %v1507_v50 = vmax.f32 %v1457_v47, 0.0  ;;  %v1899_v18 = vld [vmem:[%s2779_s7] ss:$0 sm:$0xff] }
 0x269   : > { %v1543_v54 = vmul.f32 %v1523_v12, %v1505_v14  ;;  %v1611_v59 = vmul.f32 %v1591_v5, %v1505_v14  ;;  %v1510_v12 = vld [vmem:[%s2775_s3] sm:$0x3] }
 0x26a   : > { %v1556_v55 = vsel %vm1548_vm10, %v1542_v16, 0.0  ;;  %v1623_v22 = vsel %vm1548_vm10, %v1610_v48, 0.0  ;;  %v1545_v28 = vmul.f32 %v1525_v20, %v1507_v50  ;;  %v1613_v1 = vmul.f32 %v1593_v57, %v1507_v50 }
 0x26b   : > { %v1557_v46 = vadd.f32 %v1556_v55, %v1555_v52  ;;  %v1624_v56 = vadd.f32 %v1623_v22, %v1622_v51  ;;  %v1558_v26 = vsel %vm1548_vm10, %v1543_v54, 0.0  ;;  %v1625_v40 = vsel %vm1548_vm10, %v1611_v59, 0.0 }
 0x26c   : > { %v1562_v30 = vsel %vm1548_vm10, %v1545_v28, 0.0  ;;  %v1629_v41 = vsel %vm1548_vm10, %v1613_v1, 0.0  ;;  %v1641_v5 = vmul.f32 %v1899_v18, %v1510_v12  ;;  %v1574_v43 = vmul.f32 %v1900_v38, %v1510_v12 }
 0x26d   : > { %v1559_v4 = vadd.f32 %v1558_v26, %v1557_v46  ;;  %v1626_v10 = vadd.f32 %v1625_v40, %v1624_v56  ;;  %v1477_v17 = vpop.f32.mrf.mxu2  ;;  %v1646_v57 = vstv %s1775_s23  ;;  %v1649_v50 = vstv %s1774_s28 }
 0x26e   : > { %v1508_v33 = vmax.f32 %v1477_v17, 0.0  ;;  %v1497_v37 = vpop.f32.mrf.mxu3  ;;  %v1642_v7 = vsel %vm1575_vm0, %v1641_v5, 0.0  ;;  %v1576_v9 = vsel %vm1575_vm0, %v1574_v43, 0.0 }
 0x26f   : > { %v1509_v19 = vmax.f32 %v1497_v37, 0.0  ;;  %v1628_v25 = vadd.f32 %v1627_v32, %v1626_v10  ;;  %v1561_v29 = vadd.f32 %v1560_v61, %v1559_v4 }
 0x270   : > { %v1546_v42 = vmul.f32 %v1526_v23, %v1508_v33  ;;  %v1614_v31 = vmul.f32 %v1594_v24, %v1508_v33 }
 0x271   : > { %v1547_v63 = vmul.f32 %v1527_v21, %v1509_v19  ;;  %v1615_v2 = vmul.f32 %v1595_v27, %v1509_v19  ;;  %v1630_v34 = vadd.f32 %v1629_v41, %v1628_v25  ;;  %v1563_v58 = vadd.f32 %v1562_v30, %v1561_v29 }
 0x272   : > { %v1631_v35 = vsel %vm1548_vm10, %v1614_v31, 0.0  ;;  %v1564_v36 = vsel %vm1548_vm10, %v1546_v42, 0.0 }
 0x273   : > { %v1632_v6 = vadd.f32 %v1631_v35, %v1630_v34  ;;  %v1565_v62 = vadd.f32 %v1564_v36, %v1563_v58  ;;  %v1633_v44 = vsel %vm1548_vm10, %v1615_v2, 0.0  ;;  %v1566_v13 = vsel %vm1548_vm10, %v1547_v63, 0.0 }
 0x275   : > { %v1634_v3 = vadd.f32 %v1633_v44, %v1632_v6  ;;  %v1567_v0 = vadd.f32 %v1566_v13, %v1565_v62 }
 0x277   : > { %1635 = vadd.xlane.f32.xlu1 %v1634_v3  ;;  %1568 = vadd.xlane.f32.xlu0 %v1567_v0 }
 0x27f   : > { %1643 = vadd.xlane.f32.xlu1 %v1642_v7  ;;  %1577 = vadd.xlane.f32.xlu0 %v1576_v9 }
 0x2ea   : > { %v1636_v11 = vpop.xlane.xlu1 %1635  ;;  %v1569_v45 = vpop.xlane.xlu0 %1568 }
 0x2f2   : > { %v1578_v14 = vpop.xlane.xlu0 %1577  ;;  %v1644_v20 = vpop.xlane.xlu1 %1643 }
 0x2f3   : > { %v1579_v47 = vadd.f32 %v1578_v14, %v1569_v45  ;;  %v1645_v16 = vadd.f32 %v1644_v20, %v1636_v11 }
 0x2f5   : > { %v1581_v15 = vadd.f32 %v1580_v39, %v1579_v47 }
 0x2f7   : > { %v1647_v48 = vmul.f32 %v1646_v57, %v1581_v15 }
 0x2f9   : > { %v1648_v53 = vadd.f32 %v1647_v48, %v1645_v16 }
 0x2fb   : > { %v1650_v49 = vadd.f32 %v1649_v50, %v1648_v53 }
 0x2fd   : > { %v1652_v52 = vsel %vm1651_vm14, %v1581_v15, %v1650_v49 }
 0x2fe   : > { %1654 = vst.msk [vmem:[#allocation10] sm:$0x3] %vm1653_vm2, %v1652_v52 }
 0x2ff PF: > { %p1852_p1 = scmp.eq.s32.totalorder %s2104_s13, 1  ;;  %s2034_s15 = smov [#allocation10]  }
 0x300   : > { %s1661_s12 = sshll.u32 %s2034_s15, 4  ;;  %s1663_s18 = sshll.u32 %s2781_s9, 4  ;;  %s1662_s12 = int_to_ptr.vmem [resolvable:$true] %s1661_s12  ;;  %s1664_s18 = int_to_ptr.hbm [resolvable:$true] %s1663_s18 }
 0x301   : > { %1838 = dma.vmem_to_hbm [thread:$0]  (%p1852_p1), %s1662_s12, 32, %s1664_s18, [#allocation5]  }
 0x302   : > { %2003 = dma.done.wait (%p1852_p1), [#allocation5], 32  }
 0x303   : > { %2005 = vsyncadd (%p1852_p1), [#allocation5], 4294967264 }
 0x304 PF: > { %p22_p2 = scmp.ge.s32.totalorder %s2107_s14, 4   ;;  %s2857_s30 = smov %s2012_s10 }
 0x305   : > { %s2858_s10 = smov %s2016_s11  ;;  %s2859_s11 = smov %s2117_s17 }
 0x306   : > { %s2860_s12 = smov %s2107_s14  ;;  %24 = sbr.rel (!%p22_p2) target bundleno = 6 (0x6), region = 115 }
 0x30b   :  { %1677 = vsyncpa [#allocation4], 1 }
 0x30c   :  { %1679 = vsyncpa [#allocation4 + $0x1], 1 }
 0x30d   :  { %1680 = vsyncpa [#allocation8], 1 }
 0x30e   :  { %1681 = vsyncpa [#allocation5], 1 }
 0x30f   :  { %1683 = vsyncpa [#allocation5 + $0x1], 1 }
 0x310   :  { %1684 = vsyncpa [#allocation6], 1 }
 0x311   :  { %1686 = vsyncpa [#allocation6 + $0x1], 1 }

</bundles_post_ra>
